<compile_context>
chip_gen: v5e
topology: v5e:2x2
jax: 0.10.0
libtpu: 0.0.40
codegen_flags: <defaults>
</compile_context>

<pallas_src>
import math

import jax
import jax.numpy as jnp
from jax.experimental import pallas as pl
from jax.experimental.pallas import tpu as pltpu

N_HEADS = 4
D_MODEL = 32
D_FF = 64
D_K = D_MODEL // N_HEADS
LN_EPS = 1e-5
MASK_NEG = -1e30
LANE = 128
DFF_PAD = ((D_FF + LANE - 1) // LANE) * LANE  # 128


# ----------------------------- kernel helpers -----------------------------
def _layernorm(v, g, b):
    mu = jnp.mean(v, axis=-1, keepdims=True)
    var = jnp.mean((v - mu) ** 2, axis=-1, keepdims=True)
    return (v - mu) * jax.lax.rsqrt(var + LN_EPS) * g + b


def _attention(q, k, v, bias, w_o, b_o, bt, tq, tk):
    """Multi-head attention core over a batch tile.

    q: (bt*tq, D), k/v: (bt*tk, D) -- Q already carries the 1/sqrt(d_k) scale.
    bias: additive mask bias, (bt, tq, tk) or (bt, 1, tk).
    w_o: (D, D), b_o: (1, D).
    """
    q3 = q.reshape(bt, tq, D_MODEL)
    k3 = k.reshape(bt, tk, D_MODEL)
    v3 = v.reshape(bt, tk, D_MODEL)
    heads = []
    for h in range(N_HEADS):  # static loop over heads
        lo, hi = h * D_K, (h + 1) * D_K
        s = jnp.einsum("bqd,bkd->bqk", q3[:, :, lo:hi], k3[:, :, lo:hi],
                       preferred_element_type=jnp.float32)
        s = s + bias
        s = s - jnp.max(s, axis=-1, keepdims=True)
        p = jnp.exp(s)
        p = p * pl.reciprocal(jnp.sum(p, axis=-1, keepdims=True), approx=True)
        heads.append(jnp.einsum("bqk,bkd->bqd", p, v3[:, :, lo:hi],
                                preferred_element_type=jnp.float32))
    o = jnp.concatenate(heads, axis=-1).reshape(bt * tq, D_MODEL)
    return jnp.dot(o, w_o, preferred_element_type=jnp.float32) + b_o


# -------------------------------- kernel ----------------------------------
def decoder_layer_kernel(
    x_ref, enc_ref, smask_ref, emask_ref,
    attw_ref, attb_ref, f1w_ref, f2w_ref, misc_ref,
    out_ref,
):
    bt, T, D = x_ref.shape
    S = enc_ref.shape[1]

    x = x_ref[...].reshape(bt * T, D)      # (bt*T, D)
    enc = enc_ref[...].reshape(bt * S, D)  # (bt*S, D)

    # packed small params (one vreg-shaped slab)
    misc = misc_ref[...]                   # (8, 128)
    f1b = misc[0:1, :]                     # (1, 128)
    f2b = misc[1:2, 0:D]                   # (1, 32)
    lng = misc[2:5, 0:D]                   # (3, 32)
    lnb = misc[5:8, 0:D]                   # (3, 32)

    # additive mask biases (hoisted out of the head loops; finite fill)
    sbias = jnp.where(smask_ref[...] == 0, MASK_NEG, 0.0).astype(jnp.float32)
    ebias = jnp.where(emask_ref[...] == 0, MASK_NEG, 0.0).astype(jnp.float32)

    # --- self attention: fused 128-wide [Q|K|V|O] projection of x ---
    a1w = attw_ref[0]                      # (D, 4D)
    a1b = attb_ref[0]                      # (1, 4D)
    proj = jnp.dot(x, a1w, preferred_element_type=jnp.float32) + a1b
    att1 = _attention(proj[:, 0:D], proj[:, D:2 * D], proj[:, 2 * D:3 * D],
                      sbias, a1w[:, 3 * D:], a1b[:, 3 * D:], bt, T, T)
    x1 = _layernorm(x + att1, lng[0:1, :], lnb[0:1, :])

    # --- encoder-decoder attention: Q from x1, K/V from encoder output ---
    a2w = attw_ref[1]
    a2b = attb_ref[1]
    proj_q = jnp.dot(x1, a2w, preferred_element_type=jnp.float32) + a2b
    proj_kv = jnp.dot(enc, a2w, preferred_element_type=jnp.float32) + a2b
    att2 = _attention(proj_q[:, 0:D], proj_kv[:, D:2 * D], proj_kv[:, 2 * D:3 * D],
                      ebias, a2w[:, 3 * D:], a2b[:, 3 * D:], bt, T, S)
    x2 = _layernorm(x1 + att2, lng[1:2, :], lnb[1:2, :])

    # --- feed-forward (weights zero-padded to 128 lanes) + residual + LN ---
    h = jnp.dot(x2, f1w_ref[...], preferred_element_type=jnp.float32) + f1b
    h = jnp.maximum(h, 0.0)
    ff = jnp.dot(h, f2w_ref[...], preferred_element_type=jnp.float32) + f2b
    x3 = _layernorm(x2 + ff, lng[2:3, :], lnb[2:3, :])

    out_ref[...] = x3.reshape(bt, T, D)


# -------------------------------- wrapper ----------------------------------
def decoder_layer(x, enc, self_mask, enc_mask, params, max_batch_block=8):
    B, T, D = x.shape
    S = enc.shape[1]
    assert D == D_MODEL

    a1w, a1b, a2w, a2b, f1w, f1b, f2w, f2b, lng, lnb = params
    scale = 1.0 / math.sqrt(D_K)

    # Pack [Wq*scale | Wk | Wv | Wo] -> (D, 4D) = (32, 128), lane-dense.
    def pack_attn(w, b):
        wp = jnp.concatenate([w[0] * scale, w[1], w[2], w[3]], axis=1)   # (D, 4D)
        bp = jnp.concatenate([b[0] * scale, b[1], b[2], b[3]])[None, :]  # (1, 4D)
        return wp, bp

    a1wp, a1bp = pack_attn(a1w, a1b)
    a2wp, a2bp = pack_attn(a2w, a2b)
    attw = jnp.stack([a1wp, a2wp])          # (2, D, 4D)   one DMA for both layers
    attb = jnp.stack([a1bp, a2bp])          # (2, 1, 4D)

    # Zero-pad FFN hidden dim to a multiple of 128 lanes (numerically inert).
    f1wp = jnp.zeros((D, DFF_PAD), jnp.float32).at[:, :D_FF].set(f1w)
    f2wp = jnp.zeros((DFF_PAD, D), jnp.float32).at[:D_FF, :].set(f2w)

    # Pack every tiny parameter vector into a single (8, 128) vreg-shaped slab.
    misc = jnp.zeros((8, DFF_PAD), jnp.float32)
    misc = misc.at[0, :D_FF].set(f1b.reshape(-1))     # fc1 bias
    misc = misc.at[1, :D].set(f2b.reshape(-1))        # fc2 bias
    misc = misc.at[2:5, :D].set(lng)                  # LN gammas (3, D)
    misc = misc.at[5:8, :D].set(lnb)                  # LN betas  (3, D)

    # Batch tile: process several batch elements per grid step.
    if B <= max_batch_block:
        bt = B
    else:
        bt = next((c for c in (8, 4, 2) if B % c == 0), 1)
    grid = (B // bt,)

    def full(shape):
        return pl.BlockSpec(shape, lambda i, n=len(shape): (0,) * n)

    in_specs = [
        pl.BlockSpec((bt, T, D), lambda i: (i, 0, 0)),   # x
        pl.BlockSpec((bt, S, D), lambda i: (i, 0, 0)),   # encoder_output
        pl.BlockSpec((bt, T, T), lambda i: (i, 0, 0)),   # self_mask
        pl.BlockSpec((bt, 1, S), lambda i: (i, 0, 0)),   # encoder_mask
        full((2, D, 4 * D)), full((2, 1, 4 * D)),        # packed attn W, b (both layers)
        full((D, DFF_PAD)), full((DFF_PAD, D)),          # FFN fc1 / fc2 weights
        full((8, DFF_PAD)),                              # packed small params
    ]

    return pl.pallas_call(
        decoder_layer_kernel,
        out_shape=jax.ShapeDtypeStruct((B, T, D), jnp.float32),
        grid=grid,
        in_specs=in_specs,
        out_specs=pl.BlockSpec((bt, T, D), lambda i: (i, 0, 0)),
        compiler_params=pltpu.CompilerParams(dimension_semantics=("parallel",)),
    )(x, enc, self_mask, enc_mask, attw, attb, f1wp, f2wp, misc)


# ---------------------------- pure-JAX reference ----------------------------
_HI = jax.lax.Precision.HIGHEST


def _ref_mha(xq, xkv, mask, w, b):
    B = xq.shape[0]
    q = jnp.matmul(xq, w[0], precision=_HI) + b[0]
    k = jnp.matmul(xkv, w[1], precision=_HI) + b[1]
    v = jnp.matmul(xkv, w[2], precision=_HI) + b[2]

    def split(t):
        return t.reshape(B, -1, N_HEADS, D_K).transpose(0, 2, 1, 3)

    qh, kh, vh = split(q), split(k), split(v)
    s = jnp.einsum("bhqd,bhkd->bhqk", qh, kh, precision=_HI) / math.sqrt(D_K)
    s = jnp.where(mask[:, None, :, :] == 0, MASK_NEG, s)
    p = jax.nn.softmax(s, axis=-1)
    o = jnp.einsum("bhqk,bhkd->bhqd", p, vh, precision=_HI)
    o = o.transpose(0, 2, 1, 3).reshape(B, -1, D_MODEL)
    return jnp.matmul(o, w[3], precision=_HI) + b[3]


def _ref_ln(v, g, b):
    mu = jnp.mean(v, axis=-1, keepdims=True)
    var = jnp.mean((v - mu) ** 2, axis=-1, keepdims=True)
    return (v - mu) / jnp.sqrt(var + LN_EPS) * g + b


def decoder_layer_ref(x, enc, self_mask, enc_mask, params):
    a1w, a1b, a2w, a2b, f1w, f1b, f2w, f2b, lng, lnb = params
    att1 = _ref_mha(x, x, self_mask, a1w, a1b)
    x1 = _ref_ln(x + att1, lng[0], lnb[0])
    att2 = _ref_mha(x1, enc, enc_mask, a2w, a2b)
    x2 = _ref_ln(x1 + att2, lng[1], lnb[1])
    h = jnp.maximum(jnp.matmul(x2, f1w, precision=_HI) + f1b, 0.0)
    ff = jnp.matmul(h, f2w, precision=_HI) + f2b
    return _ref_ln(x2 + ff, lng[2], lnb[2])


# --------------------------------- main -------------------------------------
def init_params(key):
    ks = jax.random.split(key, 16)
    sc = 0.05
    a1w = jax.random.normal(ks[0], (4, D_MODEL, D_MODEL), jnp.float32) * sc
    a1b = jax.random.normal(ks[1], (4, D_MODEL), jnp.float32) * sc
    a2w = jax.random.normal(ks[2], (4, D_MODEL, D_MODEL), jnp.float32) * sc
    a2b = jax.random.normal(ks[3], (4, D_MODEL), jnp.float32) * sc
    f1w = jax.random.normal(ks[4], (D_MODEL, D_FF), jnp.float32) * sc
    f1b = jax.random.normal(ks[5], (1, D_FF), jnp.float32) * sc
    f2w = jax.random.normal(ks[6], (D_FF, D_MODEL), jnp.float32) * sc
    f2b = jax.random.normal(ks[7], (1, D_MODEL), jnp.float32) * sc
    lng = jnp.ones((3, D_MODEL), jnp.float32) + jax.random.normal(ks[8], (3, D_MODEL)) * 0.01
    lnb = jax.random.normal(ks[9], (3, D_MODEL), jnp.float32) * 0.01
    return (a1w, a1b, a2w, a2b, f1w, f1b, f2w, f2b, lng, lnb)


if __name__ == "__main__":
    B, T, S = 2, 8, 8
    key = jax.random.PRNGKey(0)
    kx, ke, kp = jax.random.split(key, 3)

    x = jax.random.normal(kx, (B, T, D_MODEL), jnp.float32)
    enc = jax.random.normal(ke, (B, S, D_MODEL), jnp.float32)
    # causal self-mask; encoder mask with last two source positions padded for batch 1
    self_mask = jnp.broadcast_to(jnp.tril(jnp.ones((T, T), jnp.float32)), (B, T, T))
    enc_mask = jnp.stack([
        jnp.ones((1, S), jnp.float32),
        jnp.concatenate([jnp.ones((1, S - 2), jnp.float32),
                         jnp.zeros((1, 2), jnp.float32)], axis=-1),
    ])
    params = init_params(kp)

    out = decoder_layer(x, enc, self_mask, enc_mask, params)
    out = jax.block_until_ready(out)

    ref = decoder_layer_ref(x, enc, self_mask, enc_mask, params)
    assert out.shape == (B, T, D_MODEL)
    err = jnp.max(jnp.abs(out - ref))
    # kernel runs at default (single-pass bf16) MXU precision with f32 accumulation;
    # reference runs at HIGHEST, so allow bf16-level tolerance.
    assert jnp.allclose(out, ref, rtol=2e-2, atol=2e-2), f"max abs err {err}"

    print("KERNEL_OK")
</pallas_src>

<mosaic_0001>
module attributes {stable_mosaic.version = 11 : i64} {
  func.func @decoder_layer_kernel(%arg0: i32, %arg1: memref<2x8x32xf32, #tpu.memory_space<vmem>>, %arg2: memref<2x8x32xf32, #tpu.memory_space<vmem>>, %arg3: memref<2x8x8xf32, #tpu.memory_space<vmem>>, %arg4: memref<2x1x8xf32, #tpu.memory_space<vmem>>, %arg5: memref<2x32x128xf32, #tpu.memory_space<vmem>>, %arg6: memref<2x1x128xf32, #tpu.memory_space<vmem>>, %arg7: memref<32x128xf32, #tpu.memory_space<vmem>>, %arg8: memref<128x32xf32, #tpu.memory_space<vmem>>, %arg9: memref<8x128xf32, #tpu.memory_space<vmem>>, %arg10: memref<2x8x32xf32, #tpu.memory_space<vmem>>) attributes {dimension_semantics = [#tpu.dimension_semantics<parallel>], iteration_bounds = array<i64: 1>, scalar_prefetch = 0 : i64, scratch_operands = 0 : i64, tpu.core_type = #tpu.core_type<tc>, window_params = [{transform_indices = @transform_0, window_bounds = array<i64: 2, 8, 32>}, {transform_indices = @transform_1, window_bounds = array<i64: 2, 8, 32>}, {transform_indices = @transform_2, window_bounds = array<i64: 2, 8, 8>}, {transform_indices = @transform_3, window_bounds = array<i64: 2, 1, 8>}, {pipeline_mode = #tpu.pipeline_mode<synchronous>, transform_indices = @transform_4, window_bounds = array<i64: 2, 32, 128>}, {pipeline_mode = #tpu.pipeline_mode<synchronous>, transform_indices = @transform_5, window_bounds = array<i64: 2, 1, 128>}, {pipeline_mode = #tpu.pipeline_mode<synchronous>, transform_indices = @transform_6, window_bounds = array<i64: 32, 128>}, {pipeline_mode = #tpu.pipeline_mode<synchronous>, transform_indices = @transform_7, window_bounds = array<i64: 128, 32>}, {pipeline_mode = #tpu.pipeline_mode<synchronous>, transform_indices = @transform_8, window_bounds = array<i64: 8, 128>}, {transform_indices = @transform_9, window_bounds = array<i64: 2, 8, 32>}]} {
    %c0 = arith.constant 0 : index
    %c0_0 = arith.constant 0 : index
    %c0_1 = arith.constant 0 : index
    %0 = vector.load %arg1[%c0, %c0_0, %c0_1] : memref<2x8x32xf32, #tpu.memory_space<vmem>>, vector<2x8x32xf32>
    %1 = vector.shape_cast %0 : vector<2x8x32xf32> to vector<16x32xf32>
    %c0_2 = arith.constant 0 : index
    %c0_3 = arith.constant 0 : index
    %c0_4 = arith.constant 0 : index
    %2 = vector.load %arg2[%c0_2, %c0_3, %c0_4] : memref<2x8x32xf32, #tpu.memory_space<vmem>>, vector<2x8x32xf32>
    %3 = vector.shape_cast %2 : vector<2x8x32xf32> to vector<16x32xf32>
    %c0_5 = arith.constant 0 : index
    %c0_6 = arith.constant 0 : index
    %4 = vector.load %arg9[%c0_5, %c0_6] : memref<8x128xf32, #tpu.memory_space<vmem>>, vector<8x128xf32>
    %5 = vector.extract_strided_slice %4 {offsets = [0, 0], sizes = [1, 128], strides = [1, 1]} : vector<8x128xf32> to vector<1x128xf32>
    %6 = vector.extract_strided_slice %4 {offsets = [1, 0], sizes = [1, 32], strides = [1, 1]} : vector<8x128xf32> to vector<1x32xf32>
    %7 = vector.extract_strided_slice %4 {offsets = [2, 0], sizes = [3, 32], strides = [1, 1]} : vector<8x128xf32> to vector<3x32xf32>
    %8 = vector.extract_strided_slice %4 {offsets = [5, 0], sizes = [3, 32], strides = [1, 1]} : vector<8x128xf32> to vector<3x32xf32>
    %c0_7 = arith.constant 0 : index
    %c0_8 = arith.constant 0 : index
    %c0_9 = arith.constant 0 : index
    %9 = vector.load %arg3[%c0_7, %c0_8, %c0_9] : memref<2x8x8xf32, #tpu.memory_space<vmem>>, vector<2x8x8xf32>
    %cst = arith.constant 0.000000e+00 : f32
    %10 = vector.broadcast %cst : f32 to vector<2x8x8xf32>
    %11 = arith.cmpf oeq, %9, %10 : vector<2x8x8xf32>
    %cst_10 = arith.constant -1.000000e+30 : f32
    %cst_11 = arith.constant 0.000000e+00 : f32
    %12 = vector.broadcast %cst_10 : f32 to vector<2x8x8xf32>
    %13 = vector.broadcast %cst_11 : f32 to vector<2x8x8xf32>
    %14 = arith.select %11, %12, %13 : vector<2x8x8xi1>, vector<2x8x8xf32>
    %c0_12 = arith.constant 0 : index
    %c0_13 = arith.constant 0 : index
    %c0_14 = arith.constant 0 : index
    %15 = vector.load %arg4[%c0_12, %c0_13, %c0_14] : memref<2x1x8xf32, #tpu.memory_space<vmem>>, vector<2x1x8xf32>
    %cst_15 = arith.constant 0.000000e+00 : f32
    %16 = vector.broadcast %cst_15 : f32 to vector<2x1x8xf32>
    %17 = arith.cmpf oeq, %15, %16 : vector<2x1x8xf32>
    %cst_16 = arith.constant -1.000000e+30 : f32
    %cst_17 = arith.constant 0.000000e+00 : f32
    %18 = vector.broadcast %cst_16 : f32 to vector<2x1x8xf32>
    %19 = vector.broadcast %cst_17 : f32 to vector<2x1x8xf32>
    %20 = arith.select %17, %18, %19 : vector<2x1x8xi1>, vector<2x1x8xf32>
    %c0_18 = arith.constant 0 : index
    %c0_19 = arith.constant 0 : index
    %c0_20 = arith.constant 0 : index
    %21 = vector.load %arg5[%c0_18, %c0_19, %c0_20] : memref<2x32x128xf32, #tpu.memory_space<vmem>>, vector<1x32x128xf32>
    %22 = vector.shape_cast %21 : vector<1x32x128xf32> to vector<32x128xf32>
    %c0_21 = arith.constant 0 : index
    %c0_22 = arith.constant 0 : index
    %c0_23 = arith.constant 0 : index
    %23 = vector.load %arg6[%c0_21, %c0_22, %c0_23] : memref<2x1x128xf32, #tpu.memory_space<vmem>>, vector<1x1x128xf32>
    %24 = vector.shape_cast %23 : vector<1x1x128xf32> to vector<1x128xf32>
    %cst_24 = arith.constant dense<0.000000e+00> : vector<16x128xf32>
    %25 = tpu.matmul %1, %22, %cst_24 {dimension_numbers = #tpu.dot_dimension_numbers<[1], [0], [0], [1], [0, 0, 1, 1], [], []>} : vector<16x32xf32>, vector<32x128xf32>, vector<16x128xf32> -> vector<16x128xf32>
    %26 = vector.broadcast %24 : vector<1x128xf32> to vector<16x128xf32>
    %27 = arith.addf %25, %26 : vector<16x128xf32>
    %28 = vector.extract_strided_slice %27 {offsets = [0, 0], sizes = [16, 32], strides = [1, 1]} : vector<16x128xf32> to vector<16x32xf32>
    %29 = vector.extract_strided_slice %27 {offsets = [0, 32], sizes = [16, 32], strides = [1, 1]} : vector<16x128xf32> to vector<16x32xf32>
    %30 = vector.extract_strided_slice %27 {offsets = [0, 64], sizes = [16, 32], strides = [1, 1]} : vector<16x128xf32> to vector<16x32xf32>
    %31 = vector.extract_strided_slice %22 {offsets = [0, 96], sizes = [32, 32], strides = [1, 1]} : vector<32x128xf32> to vector<32x32xf32>
    %32 = vector.extract_strided_slice %24 {offsets = [0, 96], sizes = [1, 32], strides = [1, 1]} : vector<1x128xf32> to vector<1x32xf32>
    %33 = vector.shape_cast %28 : vector<16x32xf32> to vector<2x8x32xf32>
    %34 = vector.shape_cast %29 : vector<16x32xf32> to vector<2x8x32xf32>
    %35 = vector.shape_cast %30 : vector<16x32xf32> to vector<2x8x32xf32>
    %36 = vector.extract_strided_slice %33 {offsets = [0, 0, 0], sizes = [2, 8, 8], strides = [1, 1, 1]} : vector<2x8x32xf32> to vector<2x8x8xf32>
    %37 = vector.extract_strided_slice %34 {offsets = [0, 0, 0], sizes = [2, 8, 8], strides = [1, 1, 1]} : vector<2x8x32xf32> to vector<2x8x8xf32>
    "tpu.trace_start"() <{level = 10 : i32, message = "bqd,bkd->bqk"}> : () -> ()
    %cst_25 = arith.constant dense<0.000000e+00> : vector<2x8x8xf32>
    %38 = tpu.matmul %36, %37, %cst_25 {dimension_numbers = #tpu.dot_dimension_numbers<[2], [2], [1], [1], [0, 0, 0, 1, 1, 1], [0], [0]>} : vector<2x8x8xf32>, vector<2x8x8xf32>, vector<2x8x8xf32> -> vector<2x8x8xf32>
    "tpu.trace_stop"() : () -> ()
    %39 = arith.addf %38, %14 : vector<2x8x8xf32>
    %cst_26 = arith.constant dense<0xFF800000> : vector<2x8xf32>
    %40 = vector.multi_reduction <maximumf>, %39, %cst_26 [2] : vector<2x8x8xf32> to vector<2x8xf32>
    %41 = vector.shape_cast %40 : vector<2x8xf32> to vector<2x8x1xf32>
    %42 = vector.broadcast %41 : vector<2x8x1xf32> to vector<2x8x8xf32>
    %43 = arith.subf %39, %42 : vector<2x8x8xf32>
    %44 = math.exp %43 : vector<2x8x8xf32>
    %cst_27 = arith.constant dense<0.000000e+00> : vector<2x8xf32>
    %45 = vector.multi_reduction <add>, %44, %cst_27 [2] : vector<2x8x8xf32> to vector<2x8xf32>
    %46 = vector.shape_cast %45 : vector<2x8xf32> to vector<2x8x1xf32>
    %47 = tpu.reciprocal %46 {approx = true} : vector<2x8x1xf32> -> vector<2x8x1xf32>
    %48 = vector.broadcast %47 : vector<2x8x1xf32> to vector<2x8x8xf32>
    %49 = arith.mulf %44, %48 : vector<2x8x8xf32>
    %50 = vector.extract_strided_slice %35 {offsets = [0, 0, 0], sizes = [2, 8, 8], strides = [1, 1, 1]} : vector<2x8x32xf32> to vector<2x8x8xf32>
    "tpu.trace_start"() <{level = 10 : i32, message = "bqk,bkd->bqd"}> : () -> ()
    %cst_28 = arith.constant dense<0.000000e+00> : vector<2x8x8xf32>
    %51 = tpu.matmul %49, %50, %cst_28 {dimension_numbers = #tpu.dot_dimension_numbers<[2], [1], [1], [2], [0, 0, 0, 1, 1, 2], [0], [0]>} : vector<2x8x8xf32>, vector<2x8x8xf32>, vector<2x8x8xf32> -> vector<2x8x8xf32>
    "tpu.trace_stop"() : () -> ()
    %52 = vector.extract_strided_slice %33 {offsets = [0, 0, 8], sizes = [2, 8, 8], strides = [1, 1, 1]} : vector<2x8x32xf32> to vector<2x8x8xf32>
    %53 = vector.extract_strided_slice %34 {offsets = [0, 0, 8], sizes = [2, 8, 8], strides = [1, 1, 1]} : vector<2x8x32xf32> to vector<2x8x8xf32>
    "tpu.trace_start"() <{level = 10 : i32, message = "bqd,bkd->bqk"}> : () -> ()
    %cst_29 = arith.constant dense<0.000000e+00> : vector<2x8x8xf32>
    %54 = tpu.matmul %52, %53, %cst_29 {dimension_numbers = #tpu.dot_dimension_numbers<[2], [2], [1], [1], [0, 0, 0, 1, 1, 1], [0], [0]>} : vector<2x8x8xf32>, vector<2x8x8xf32>, vector<2x8x8xf32> -> vector<2x8x8xf32>
    "tpu.trace_stop"() : () -> ()
    %55 = arith.addf %54, %14 : vector<2x8x8xf32>
    %cst_30 = arith.constant dense<0xFF800000> : vector<2x8xf32>
    %56 = vector.multi_reduction <maximumf>, %55, %cst_30 [2] : vector<2x8x8xf32> to vector<2x8xf32>
    %57 = vector.shape_cast %56 : vector<2x8xf32> to vector<2x8x1xf32>
    %58 = vector.broadcast %57 : vector<2x8x1xf32> to vector<2x8x8xf32>
    %59 = arith.subf %55, %58 : vector<2x8x8xf32>
    %60 = math.exp %59 : vector<2x8x8xf32>
    %cst_31 = arith.constant dense<0.000000e+00> : vector<2x8xf32>
    %61 = vector.multi_reduction <add>, %60, %cst_31 [2] : vector<2x8x8xf32> to vector<2x8xf32>
    %62 = vector.shape_cast %61 : vector<2x8xf32> to vector<2x8x1xf32>
    %63 = tpu.reciprocal %62 {approx = true} : vector<2x8x1xf32> -> vector<2x8x1xf32>
    %64 = vector.broadcast %63 : vector<2x8x1xf32> to vector<2x8x8xf32>
    %65 = arith.mulf %60, %64 : vector<2x8x8xf32>
    %66 = vector.extract_strided_slice %35 {offsets = [0, 0, 8], sizes = [2, 8, 8], strides = [1, 1, 1]} : vector<2x8x32xf32> to vector<2x8x8xf32>
    "tpu.trace_start"() <{level = 10 : i32, message = "bqk,bkd->bqd"}> : () -> ()
    %cst_32 = arith.constant dense<0.000000e+00> : vector<2x8x8xf32>
    %67 = tpu.matmul %65, %66, %cst_32 {dimension_numbers = #tpu.dot_dimension_numbers<[2], [1], [1], [2], [0, 0, 0, 1, 1, 2], [0], [0]>} : vector<2x8x8xf32>, vector<2x8x8xf32>, vector<2x8x8xf32> -> vector<2x8x8xf32>
    "tpu.trace_stop"() : () -> ()
    %68 = vector.extract_strided_slice %33 {offsets = [0, 0, 16], sizes = [2, 8, 8], strides = [1, 1, 1]} : vector<2x8x32xf32> to vector<2x8x8xf32>
    %69 = vector.extract_strided_slice %34 {offsets = [0, 0, 16], sizes = [2, 8, 8], strides = [1, 1, 1]} : vector<2x8x32xf32> to vector<2x8x8xf32>
    "tpu.trace_start"() <{level = 10 : i32, message = "bqd,bkd->bqk"}> : () -> ()
    %cst_33 = arith.constant dense<0.000000e+00> : vector<2x8x8xf32>
    %70 = tpu.matmul %68, %69, %cst_33 {dimension_numbers = #tpu.dot_dimension_numbers<[2], [2], [1], [1], [0, 0, 0, 1, 1, 1], [0], [0]>} : vector<2x8x8xf32>, vector<2x8x8xf32>, vector<2x8x8xf32> -> vector<2x8x8xf32>
    "tpu.trace_stop"() : () -> ()
    %71 = arith.addf %70, %14 : vector<2x8x8xf32>
    %cst_34 = arith.constant dense<0xFF800000> : vector<2x8xf32>
    %72 = vector.multi_reduction <maximumf>, %71, %cst_34 [2] : vector<2x8x8xf32> to vector<2x8xf32>
    %73 = vector.shape_cast %72 : vector<2x8xf32> to vector<2x8x1xf32>
    %74 = vector.broadcast %73 : vector<2x8x1xf32> to vector<2x8x8xf32>
    %75 = arith.subf %71, %74 : vector<2x8x8xf32>
    %76 = math.exp %75 : vector<2x8x8xf32>
    %cst_35 = arith.constant dense<0.000000e+00> : vector<2x8xf32>
    %77 = vector.multi_reduction <add>, %76, %cst_35 [2] : vector<2x8x8xf32> to vector<2x8xf32>
    %78 = vector.shape_cast %77 : vector<2x8xf32> to vector<2x8x1xf32>
    %79 = tpu.reciprocal %78 {approx = true} : vector<2x8x1xf32> -> vector<2x8x1xf32>
    %80 = vector.broadcast %79 : vector<2x8x1xf32> to vector<2x8x8xf32>
    %81 = arith.mulf %76, %80 : vector<2x8x8xf32>
    %82 = vector.extract_strided_slice %35 {offsets = [0, 0, 16], sizes = [2, 8, 8], strides = [1, 1, 1]} : vector<2x8x32xf32> to vector<2x8x8xf32>
    "tpu.trace_start"() <{level = 10 : i32, message = "bqk,bkd->bqd"}> : () -> ()
    %cst_36 = arith.constant dense<0.000000e+00> : vector<2x8x8xf32>
    %83 = tpu.matmul %81, %82, %cst_36 {dimension_numbers = #tpu.dot_dimension_numbers<[2], [1], [1], [2], [0, 0, 0, 1, 1, 2], [0], [0]>} : vector<2x8x8xf32>, vector<2x8x8xf32>, vector<2x8x8xf32> -> vector<2x8x8xf32>
    "tpu.trace_stop"() : () -> ()
    %84 = vector.extract_strided_slice %33 {offsets = [0, 0, 24], sizes = [2, 8, 8], strides = [1, 1, 1]} : vector<2x8x32xf32> to vector<2x8x8xf32>
    %85 = vector.extract_strided_slice %34 {offsets = [0, 0, 24], sizes = [2, 8, 8], strides = [1, 1, 1]} : vector<2x8x32xf32> to vector<2x8x8xf32>
    "tpu.trace_start"() <{level = 10 : i32, message = "bqd,bkd->bqk"}> : () -> ()
    %cst_37 = arith.constant dense<0.000000e+00> : vector<2x8x8xf32>
    %86 = tpu.matmul %84, %85, %cst_37 {dimension_numbers = #tpu.dot_dimension_numbers<[2], [2], [1], [1], [0, 0, 0, 1, 1, 1], [0], [0]>} : vector<2x8x8xf32>, vector<2x8x8xf32>, vector<2x8x8xf32> -> vector<2x8x8xf32>
    "tpu.trace_stop"() : () -> ()
    %87 = arith.addf %86, %14 : vector<2x8x8xf32>
    %cst_38 = arith.constant dense<0xFF800000> : vector<2x8xf32>
    %88 = vector.multi_reduction <maximumf>, %87, %cst_38 [2] : vector<2x8x8xf32> to vector<2x8xf32>
    %89 = vector.shape_cast %88 : vector<2x8xf32> to vector<2x8x1xf32>
    %90 = vector.broadcast %89 : vector<2x8x1xf32> to vector<2x8x8xf32>
    %91 = arith.subf %87, %90 : vector<2x8x8xf32>
    %92 = math.exp %91 : vector<2x8x8xf32>
    %cst_39 = arith.constant dense<0.000000e+00> : vector<2x8xf32>
    %93 = vector.multi_reduction <add>, %92, %cst_39 [2] : vector<2x8x8xf32> to vector<2x8xf32>
    %94 = vector.shape_cast %93 : vector<2x8xf32> to vector<2x8x1xf32>
    %95 = tpu.reciprocal %94 {approx = true} : vector<2x8x1xf32> -> vector<2x8x1xf32>
    %96 = vector.broadcast %95 : vector<2x8x1xf32> to vector<2x8x8xf32>
    %97 = arith.mulf %92, %96 : vector<2x8x8xf32>
    %98 = vector.extract_strided_slice %35 {offsets = [0, 0, 24], sizes = [2, 8, 8], strides = [1, 1, 1]} : vector<2x8x32xf32> to vector<2x8x8xf32>
    "tpu.trace_start"() <{level = 10 : i32, message = "bqk,bkd->bqd"}> : () -> ()
    %cst_40 = arith.constant dense<0.000000e+00> : vector<2x8x8xf32>
    %99 = tpu.matmul %97, %98, %cst_40 {dimension_numbers = #tpu.dot_dimension_numbers<[2], [1], [1], [2], [0, 0, 0, 1, 1, 2], [0], [0]>} : vector<2x8x8xf32>, vector<2x8x8xf32>, vector<2x8x8xf32> -> vector<2x8x8xf32>
    "tpu.trace_stop"() : () -> ()
    %100 = tpu.concatenate %51, %67, %83, %99 in 2 : vector<2x8x8xf32>, vector<2x8x8xf32>, vector<2x8x8xf32>, vector<2x8x8xf32> -> vector<2x8x32xf32>
    %101 = vector.shape_cast %100 : vector<2x8x32xf32> to vector<16x32xf32>
    %cst_41 = arith.constant dense<0.000000e+00> : vector<16x32xf32>
    %102 = tpu.matmul %101, %31, %cst_41 {dimension_numbers = #tpu.dot_dimension_numbers<[1], [0], [0], [1], [0, 0, 1, 1], [], []>} : vector<16x32xf32>, vector<32x32xf32>, vector<16x32xf32> -> vector<16x32xf32>
    %103 = vector.broadcast %32 : vector<1x32xf32> to vector<16x32xf32>
    %104 = arith.addf %102, %103 : vector<16x32xf32>
    %105 = arith.addf %1, %104 : vector<16x32xf32>
    %106 = vector.extract_strided_slice %7 {offsets = [0, 0], sizes = [1, 32], strides = [1, 1]} : vector<3x32xf32> to vector<1x32xf32>
    %107 = vector.extract_strided_slice %8 {offsets = [0, 0], sizes = [1, 32], strides = [1, 1]} : vector<3x32xf32> to vector<1x32xf32>
    %cst_42 = arith.constant dense<0.000000e+00> : vector<16xf32>
    %108 = vector.multi_reduction <add>, %105, %cst_42 [1] : vector<16x32xf32> to vector<16xf32>
    %109 = vector.shape_cast %108 : vector<16xf32> to vector<16x1xf32>
    %cst_43 = arith.constant 3.200000e+01 : f32
    %110 = vector.broadcast %cst_43 : f32 to vector<16x1xf32>
    %111 = arith.divf %109, %110 : vector<16x1xf32>
    %112 = vector.broadcast %111 : vector<16x1xf32> to vector<16x32xf32>
    %113 = arith.subf %105, %112 : vector<16x32xf32>
    %114 = arith.mulf %113, %113 : vector<16x32xf32>
    %cst_44 = arith.constant dense<0.000000e+00> : vector<16xf32>
    %115 = vector.multi_reduction <add>, %114, %cst_44 [1] : vector<16x32xf32> to vector<16xf32>
    %116 = vector.shape_cast %115 : vector<16xf32> to vector<16x1xf32>
    %cst_45 = arith.constant 3.200000e+01 : f32
    %117 = vector.broadcast %cst_45 : f32 to vector<16x1xf32>
    %118 = arith.divf %116, %117 : vector<16x1xf32>
    %119 = vector.broadcast %111 : vector<16x1xf32> to vector<16x32xf32>
    %120 = arith.subf %105, %119 : vector<16x32xf32>
    %cst_46 = arith.constant 9.99999974E-6 : f32
    %121 = vector.broadcast %cst_46 : f32 to vector<16x1xf32>
    %122 = arith.addf %118, %121 : vector<16x1xf32>
    %123 = math.rsqrt %122 : vector<16x1xf32>
    %124 = vector.broadcast %123 : vector<16x1xf32> to vector<16x32xf32>
    %125 = arith.mulf %120, %124 : vector<16x32xf32>
    %126 = vector.broadcast %106 : vector<1x32xf32> to vector<16x32xf32>
    %127 = arith.mulf %125, %126 : vector<16x32xf32>
    %128 = vector.broadcast %107 : vector<1x32xf32> to vector<16x32xf32>
    %129 = arith.addf %127, %128 : vector<16x32xf32>
    %c1 = arith.constant 1 : index
    %c0_47 = arith.constant 0 : index
    %c0_48 = arith.constant 0 : index
    %130 = vector.load %arg5[%c1, %c0_47, %c0_48] : memref<2x32x128xf32, #tpu.memory_space<vmem>>, vector<1x32x128xf32>
    %131 = vector.shape_cast %130 : vector<1x32x128xf32> to vector<32x128xf32>
    %c1_49 = arith.constant 1 : index
    %c0_50 = arith.constant 0 : index
    %c0_51 = arith.constant 0 : index
    %132 = vector.load %arg6[%c1_49, %c0_50, %c0_51] : memref<2x1x128xf32, #tpu.memory_space<vmem>>, vector<1x1x128xf32>
    %133 = vector.shape_cast %132 : vector<1x1x128xf32> to vector<1x128xf32>
    %cst_52 = arith.constant dense<0.000000e+00> : vector<16x128xf32>
    %134 = tpu.matmul %129, %131, %cst_52 {dimension_numbers = #tpu.dot_dimension_numbers<[1], [0], [0], [1], [0, 0, 1, 1], [], []>} : vector<16x32xf32>, vector<32x128xf32>, vector<16x128xf32> -> vector<16x128xf32>
    %135 = vector.broadcast %133 : vector<1x128xf32> to vector<16x128xf32>
    %136 = arith.addf %134, %135 : vector<16x128xf32>
    %cst_53 = arith.constant dense<0.000000e+00> : vector<16x128xf32>
    %137 = tpu.matmul %3, %131, %cst_53 {dimension_numbers = #tpu.dot_dimension_numbers<[1], [0], [0], [1], [0, 0, 1, 1], [], []>} : vector<16x32xf32>, vector<32x128xf32>, vector<16x128xf32> -> vector<16x128xf32>
    %138 = vector.broadcast %133 : vector<1x128xf32> to vector<16x128xf32>
    %139 = arith.addf %137, %138 : vector<16x128xf32>
    %140 = vector.extract_strided_slice %136 {offsets = [0, 0], sizes = [16, 32], strides = [1, 1]} : vector<16x128xf32> to vector<16x32xf32>
    %141 = vector.extract_strided_slice %139 {offsets = [0, 32], sizes = [16, 32], strides = [1, 1]} : vector<16x128xf32> to vector<16x32xf32>
    %142 = vector.extract_strided_slice %139 {offsets = [0, 64], sizes = [16, 32], strides = [1, 1]} : vector<16x128xf32> to vector<16x32xf32>
    %143 = vector.extract_strided_slice %131 {offsets = [0, 96], sizes = [32, 32], strides = [1, 1]} : vector<32x128xf32> to vector<32x32xf32>
    %144 = vector.extract_strided_slice %133 {offsets = [0, 96], sizes = [1, 32], strides = [1, 1]} : vector<1x128xf32> to vector<1x32xf32>
    %145 = vector.shape_cast %140 : vector<16x32xf32> to vector<2x8x32xf32>
    %146 = vector.shape_cast %141 : vector<16x32xf32> to vector<2x8x32xf32>
    %147 = vector.shape_cast %142 : vector<16x32xf32> to vector<2x8x32xf32>
    %148 = vector.extract_strided_slice %145 {offsets = [0, 0, 0], sizes = [2, 8, 8], strides = [1, 1, 1]} : vector<2x8x32xf32> to vector<2x8x8xf32>
    %149 = vector.extract_strided_slice %146 {offsets = [0, 0, 0], sizes = [2, 8, 8], strides = [1, 1, 1]} : vector<2x8x32xf32> to vector<2x8x8xf32>
    "tpu.trace_start"() <{level = 10 : i32, message = "bqd,bkd->bqk"}> : () -> ()
    %cst_54 = arith.constant dense<0.000000e+00> : vector<2x8x8xf32>
    %150 = tpu.matmul %148, %149, %cst_54 {dimension_numbers = #tpu.dot_dimension_numbers<[2], [2], [1], [1], [0, 0, 0, 1, 1, 1], [0], [0]>} : vector<2x8x8xf32>, vector<2x8x8xf32>, vector<2x8x8xf32> -> vector<2x8x8xf32>
    "tpu.trace_stop"() : () -> ()
    %151 = vector.broadcast %20 : vector<2x1x8xf32> to vector<2x8x8xf32>
    %152 = arith.addf %150, %151 : vector<2x8x8xf32>
    %cst_55 = arith.constant dense<0xFF800000> : vector<2x8xf32>
    %153 = vector.multi_reduction <maximumf>, %152, %cst_55 [2] : vector<2x8x8xf32> to vector<2x8xf32>
    %154 = vector.shape_cast %153 : vector<2x8xf32> to vector<2x8x1xf32>
    %155 = vector.broadcast %154 : vector<2x8x1xf32> to vector<2x8x8xf32>
    %156 = arith.subf %152, %155 : vector<2x8x8xf32>
    %157 = math.exp %156 : vector<2x8x8xf32>
    %cst_56 = arith.constant dense<0.000000e+00> : vector<2x8xf32>
    %158 = vector.multi_reduction <add>, %157, %cst_56 [2] : vector<2x8x8xf32> to vector<2x8xf32>
    %159 = vector.shape_cast %158 : vector<2x8xf32> to vector<2x8x1xf32>
    %160 = tpu.reciprocal %159 {approx = true} : vector<2x8x1xf32> -> vector<2x8x1xf32>
    %161 = vector.broadcast %160 : vector<2x8x1xf32> to vector<2x8x8xf32>
    %162 = arith.mulf %157, %161 : vector<2x8x8xf32>
    %163 = vector.extract_strided_slice %147 {offsets = [0, 0, 0], sizes = [2, 8, 8], strides = [1, 1, 1]} : vector<2x8x32xf32> to vector<2x8x8xf32>
    "tpu.trace_start"() <{level = 10 : i32, message = "bqk,bkd->bqd"}> : () -> ()
    %cst_57 = arith.constant dense<0.000000e+00> : vector<2x8x8xf32>
    %164 = tpu.matmul %162, %163, %cst_57 {dimension_numbers = #tpu.dot_dimension_numbers<[2], [1], [1], [2], [0, 0, 0, 1, 1, 2], [0], [0]>} : vector<2x8x8xf32>, vector<2x8x8xf32>, vector<2x8x8xf32> -> vector<2x8x8xf32>
    "tpu.trace_stop"() : () -> ()
    %165 = vector.extract_strided_slice %145 {offsets = [0, 0, 8], sizes = [2, 8, 8], strides = [1, 1, 1]} : vector<2x8x32xf32> to vector<2x8x8xf32>
    %166 = vector.extract_strided_slice %146 {offsets = [0, 0, 8], sizes = [2, 8, 8], strides = [1, 1, 1]} : vector<2x8x32xf32> to vector<2x8x8xf32>
    "tpu.trace_start"() <{level = 10 : i32, message = "bqd,bkd->bqk"}> : () -> ()
    %cst_58 = arith.constant dense<0.000000e+00> : vector<2x8x8xf32>
    %167 = tpu.matmul %165, %166, %cst_58 {dimension_numbers = #tpu.dot_dimension_numbers<[2], [2], [1], [1], [0, 0, 0, 1, 1, 1], [0], [0]>} : vector<2x8x8xf32>, vector<2x8x8xf32>, vector<2x8x8xf32> -> vector<2x8x8xf32>
    "tpu.trace_stop"() : () -> ()
    %168 = vector.broadcast %20 : vector<2x1x8xf32> to vector<2x8x8xf32>
    %169 = arith.addf %167, %168 : vector<2x8x8xf32>
    %cst_59 = arith.constant dense<0xFF800000> : vector<2x8xf32>
    %170 = vector.multi_reduction <maximumf>, %169, %cst_59 [2] : vector<2x8x8xf32> to vector<2x8xf32>
    %171 = vector.shape_cast %170 : vector<2x8xf32> to vector<2x8x1xf32>
    %172 = vector.broadcast %171 : vector<2x8x1xf32> to vector<2x8x8xf32>
    %173 = arith.subf %169, %172 : vector<2x8x8xf32>
    %174 = math.exp %173 : vector<2x8x8xf32>
    %cst_60 = arith.constant dense<0.000000e+00> : vector<2x8xf32>
    %175 = vector.multi_reduction <add>, %174, %cst_60 [2] : vector<2x8x8xf32> to vector<2x8xf32>
    %176 = vector.shape_cast %175 : vector<2x8xf32> to vector<2x8x1xf32>
    %177 = tpu.reciprocal %176 {approx = true} : vector<2x8x1xf32> -> vector<2x8x1xf32>
    %178 = vector.broadcast %177 : vector<2x8x1xf32> to vector<2x8x8xf32>
    %179 = arith.mulf %174, %178 : vector<2x8x8xf32>
    %180 = vector.extract_strided_slice %147 {offsets = [0, 0, 8], sizes = [2, 8, 8], strides = [1, 1, 1]} : vector<2x8x32xf32> to vector<2x8x8xf32>
    "tpu.trace_start"() <{level = 10 : i32, message = "bqk,bkd->bqd"}> : () -> ()
    %cst_61 = arith.constant dense<0.000000e+00> : vector<2x8x8xf32>
    %181 = tpu.matmul %179, %180, %cst_61 {dimension_numbers = #tpu.dot_dimension_numbers<[2], [1], [1], [2], [0, 0, 0, 1, 1, 2], [0], [0]>} : vector<2x8x8xf32>, vector<2x8x8xf32>, vector<2x8x8xf32> -> vector<2x8x8xf32>
    "tpu.trace_stop"() : () -> ()
    %182 = vector.extract_strided_slice %145 {offsets = [0, 0, 16], sizes = [2, 8, 8], strides = [1, 1, 1]} : vector<2x8x32xf32> to vector<2x8x8xf32>
    %183 = vector.extract_strided_slice %146 {offsets = [0, 0, 16], sizes = [2, 8, 8], strides = [1, 1, 1]} : vector<2x8x32xf32> to vector<2x8x8xf32>
    "tpu.trace_start"() <{level = 10 : i32, message = "bqd,bkd->bqk"}> : () -> ()
    %cst_62 = arith.constant dense<0.000000e+00> : vector<2x8x8xf32>
    %184 = tpu.matmul %182, %183, %cst_62 {dimension_numbers = #tpu.dot_dimension_numbers<[2], [2], [1], [1], [0, 0, 0, 1, 1, 1], [0], [0]>} : vector<2x8x8xf32>, vector<2x8x8xf32>, vector<2x8x8xf32> -> vector<2x8x8xf32>
    "tpu.trace_stop"() : () -> ()
    %185 = vector.broadcast %20 : vector<2x1x8xf32> to vector<2x8x8xf32>
    %186 = arith.addf %184, %185 : vector<2x8x8xf32>
    %cst_63 = arith.constant dense<0xFF800000> : vector<2x8xf32>
    %187 = vector.multi_reduction <maximumf>, %186, %cst_63 [2] : vector<2x8x8xf32> to vector<2x8xf32>
    %188 = vector.shape_cast %187 : vector<2x8xf32> to vector<2x8x1xf32>
    %189 = vector.broadcast %188 : vector<2x8x1xf32> to vector<2x8x8xf32>
    %190 = arith.subf %186, %189 : vector<2x8x8xf32>
    %191 = math.exp %190 : vector<2x8x8xf32>
    %cst_64 = arith.constant dense<0.000000e+00> : vector<2x8xf32>
    %192 = vector.multi_reduction <add>, %191, %cst_64 [2] : vector<2x8x8xf32> to vector<2x8xf32>
    %193 = vector.shape_cast %192 : vector<2x8xf32> to vector<2x8x1xf32>
    %194 = tpu.reciprocal %193 {approx = true} : vector<2x8x1xf32> -> vector<2x8x1xf32>
    %195 = vector.broadcast %194 : vector<2x8x1xf32> to vector<2x8x8xf32>
    %196 = arith.mulf %191, %195 : vector<2x8x8xf32>
    %197 = vector.extract_strided_slice %147 {offsets = [0, 0, 16], sizes = [2, 8, 8], strides = [1, 1, 1]} : vector<2x8x32xf32> to vector<2x8x8xf32>
    "tpu.trace_start"() <{level = 10 : i32, message = "bqk,bkd->bqd"}> : () -> ()
    %cst_65 = arith.constant dense<0.000000e+00> : vector<2x8x8xf32>
    %198 = tpu.matmul %196, %197, %cst_65 {dimension_numbers = #tpu.dot_dimension_numbers<[2], [1], [1], [2], [0, 0, 0, 1, 1, 2], [0], [0]>} : vector<2x8x8xf32>, vector<2x8x8xf32>, vector<2x8x8xf32> -> vector<2x8x8xf32>
    "tpu.trace_stop"() : () -> ()
    %199 = vector.extract_strided_slice %145 {offsets = [0, 0, 24], sizes = [2, 8, 8], strides = [1, 1, 1]} : vector<2x8x32xf32> to vector<2x8x8xf32>
    %200 = vector.extract_strided_slice %146 {offsets = [0, 0, 24], sizes = [2, 8, 8], strides = [1, 1, 1]} : vector<2x8x32xf32> to vector<2x8x8xf32>
    "tpu.trace_start"() <{level = 10 : i32, message = "bqd,bkd->bqk"}> : () -> ()
    %cst_66 = arith.constant dense<0.000000e+00> : vector<2x8x8xf32>
    %201 = tpu.matmul %199, %200, %cst_66 {dimension_numbers = #tpu.dot_dimension_numbers<[2], [2], [1], [1], [0, 0, 0, 1, 1, 1], [0], [0]>} : vector<2x8x8xf32>, vector<2x8x8xf32>, vector<2x8x8xf32> -> vector<2x8x8xf32>
    "tpu.trace_stop"() : () -> ()
    %202 = vector.broadcast %20 : vector<2x1x8xf32> to vector<2x8x8xf32>
    %203 = arith.addf %201, %202 : vector<2x8x8xf32>
    %cst_67 = arith.constant dense<0xFF800000> : vector<2x8xf32>
    %204 = vector.multi_reduction <maximumf>, %203, %cst_67 [2] : vector<2x8x8xf32> to vector<2x8xf32>
    %205 = vector.shape_cast %204 : vector<2x8xf32> to vector<2x8x1xf32>
    %206 = vector.broadcast %205 : vector<2x8x1xf32> to vector<2x8x8xf32>
    %207 = arith.subf %203, %206 : vector<2x8x8xf32>
    %208 = math.exp %207 : vector<2x8x8xf32>
    %cst_68 = arith.constant dense<0.000000e+00> : vector<2x8xf32>
    %209 = vector.multi_reduction <add>, %208, %cst_68 [2] : vector<2x8x8xf32> to vector<2x8xf32>
    %210 = vector.shape_cast %209 : vector<2x8xf32> to vector<2x8x1xf32>
    %211 = tpu.reciprocal %210 {approx = true} : vector<2x8x1xf32> -> vector<2x8x1xf32>
    %212 = vector.broadcast %211 : vector<2x8x1xf32> to vector<2x8x8xf32>
    %213 = arith.mulf %208, %212 : vector<2x8x8xf32>
    %214 = vector.extract_strided_slice %147 {offsets = [0, 0, 24], sizes = [2, 8, 8], strides = [1, 1, 1]} : vector<2x8x32xf32> to vector<2x8x8xf32>
    "tpu.trace_start"() <{level = 10 : i32, message = "bqk,bkd->bqd"}> : () -> ()
    %cst_69 = arith.constant dense<0.000000e+00> : vector<2x8x8xf32>
    %215 = tpu.matmul %213, %214, %cst_69 {dimension_numbers = #tpu.dot_dimension_numbers<[2], [1], [1], [2], [0, 0, 0, 1, 1, 2], [0], [0]>} : vector<2x8x8xf32>, vector<2x8x8xf32>, vector<2x8x8xf32> -> vector<2x8x8xf32>
    "tpu.trace_stop"() : () -> ()
    %216 = tpu.concatenate %164, %181, %198, %215 in 2 : vector<2x8x8xf32>, vector<2x8x8xf32>, vector<2x8x8xf32>, vector<2x8x8xf32> -> vector<2x8x32xf32>
    %217 = vector.shape_cast %216 : vector<2x8x32xf32> to vector<16x32xf32>
    %cst_70 = arith.constant dense<0.000000e+00> : vector<16x32xf32>
    %218 = tpu.matmul %217, %143, %cst_70 {dimension_numbers = #tpu.dot_dimension_numbers<[1], [0], [0], [1], [0, 0, 1, 1], [], []>} : vector<16x32xf32>, vector<32x32xf32>, vector<16x32xf32> -> vector<16x32xf32>
    %219 = vector.broadcast %144 : vector<1x32xf32> to vector<16x32xf32>
    %220 = arith.addf %218, %219 : vector<16x32xf32>
    %221 = arith.addf %129, %220 : vector<16x32xf32>
    %222 = vector.extract_strided_slice %7 {offsets = [1, 0], sizes = [1, 32], strides = [1, 1]} : vector<3x32xf32> to vector<1x32xf32>
    %223 = vector.extract_strided_slice %8 {offsets = [1, 0], sizes = [1, 32], strides = [1, 1]} : vector<3x32xf32> to vector<1x32xf32>
    %cst_71 = arith.constant dense<0.000000e+00> : vector<16xf32>
    %224 = vector.multi_reduction <add>, %221, %cst_71 [1] : vector<16x32xf32> to vector<16xf32>
    %225 = vector.shape_cast %224 : vector<16xf32> to vector<16x1xf32>
    %cst_72 = arith.constant 3.200000e+01 : f32
    %226 = vector.broadcast %cst_72 : f32 to vector<16x1xf32>
    %227 = arith.divf %225, %226 : vector<16x1xf32>
    %228 = vector.broadcast %227 : vector<16x1xf32> to vector<16x32xf32>
    %229 = arith.subf %221, %228 : vector<16x32xf32>
    %230 = arith.mulf %229, %229 : vector<16x32xf32>
    %cst_73 = arith.constant dense<0.000000e+00> : vector<16xf32>
    %231 = vector.multi_reduction <add>, %230, %cst_73 [1] : vector<16x32xf32> to vector<16xf32>
    %232 = vector.shape_cast %231 : vector<16xf32> to vector<16x1xf32>
    %cst_74 = arith.constant 3.200000e+01 : f32
    %233 = vector.broadcast %cst_74 : f32 to vector<16x1xf32>
    %234 = arith.divf %232, %233 : vector<16x1xf32>
    %235 = vector.broadcast %227 : vector<16x1xf32> to vector<16x32xf32>
    %236 = arith.subf %221, %235 : vector<16x32xf32>
    %cst_75 = arith.constant 9.99999974E-6 : f32
    %237 = vector.broadcast %cst_75 : f32 to vector<16x1xf32>
    %238 = arith.addf %234, %237 : vector<16x1xf32>
    %239 = math.rsqrt %238 : vector<16x1xf32>
    %240 = vector.broadcast %239 : vector<16x1xf32> to vector<16x32xf32>
    %241 = arith.mulf %236, %240 : vector<16x32xf32>
    %242 = vector.broadcast %222 : vector<1x32xf32> to vector<16x32xf32>
    %243 = arith.mulf %241, %242 : vector<16x32xf32>
    %244 = vector.broadcast %223 : vector<1x32xf32> to vector<16x32xf32>
    %245 = arith.addf %243, %244 : vector<16x32xf32>
    %c0_76 = arith.constant 0 : index
    %c0_77 = arith.constant 0 : index
    %246 = vector.load %arg7[%c0_76, %c0_77] : memref<32x128xf32, #tpu.memory_space<vmem>>, vector<32x128xf32>
    %cst_78 = arith.constant dense<0.000000e+00> : vector<16x128xf32>
    %247 = tpu.matmul %245, %246, %cst_78 {dimension_numbers = #tpu.dot_dimension_numbers<[1], [0], [0], [1], [0, 0, 1, 1], [], []>} : vector<16x32xf32>, vector<32x128xf32>, vector<16x128xf32> -> vector<16x128xf32>
    %248 = vector.broadcast %5 : vector<1x128xf32> to vector<16x128xf32>
    %249 = arith.addf %247, %248 : vector<16x128xf32>
    %cst_79 = arith.constant 0.000000e+00 : f32
    %250 = vector.broadcast %cst_79 : f32 to vector<16x128xf32>
    %251 = arith.maximumf %249, %250 : vector<16x128xf32>
    %c0_80 = arith.constant 0 : index
    %c0_81 = arith.constant 0 : index
    %252 = vector.load %arg8[%c0_80, %c0_81] : memref<128x32xf32, #tpu.memory_space<vmem>>, vector<128x32xf32>
    %cst_82 = arith.constant dense<0.000000e+00> : vector<16x32xf32>
    %253 = tpu.matmul %251, %252, %cst_82 {dimension_numbers = #tpu.dot_dimension_numbers<[1], [0], [0], [1], [0, 0, 1, 1], [], []>} : vector<16x128xf32>, vector<128x32xf32>, vector<16x32xf32> -> vector<16x32xf32>
    %254 = vector.broadcast %6 : vector<1x32xf32> to vector<16x32xf32>
    %255 = arith.addf %253, %254 : vector<16x32xf32>
    %256 = arith.addf %245, %255 : vector<16x32xf32>
    %257 = vector.extract_strided_slice %7 {offsets = [2, 0], sizes = [1, 32], strides = [1, 1]} : vector<3x32xf32> to vector<1x32xf32>
    %258 = vector.extract_strided_slice %8 {offsets = [2, 0], sizes = [1, 32], strides = [1, 1]} : vector<3x32xf32> to vector<1x32xf32>
    %cst_83 = arith.constant dense<0.000000e+00> : vector<16xf32>
    %259 = vector.multi_reduction <add>, %256, %cst_83 [1] : vector<16x32xf32> to vector<16xf32>
    %260 = vector.shape_cast %259 : vector<16xf32> to vector<16x1xf32>
    %cst_84 = arith.constant 3.200000e+01 : f32
    %261 = vector.broadcast %cst_84 : f32 to vector<16x1xf32>
    %262 = arith.divf %260, %261 : vector<16x1xf32>
    %263 = vector.broadcast %262 : vector<16x1xf32> to vector<16x32xf32>
    %264 = arith.subf %256, %263 : vector<16x32xf32>
    %265 = arith.mulf %264, %264 : vector<16x32xf32>
    %cst_85 = arith.constant dense<0.000000e+00> : vector<16xf32>
    %266 = vector.multi_reduction <add>, %265, %cst_85 [1] : vector<16x32xf32> to vector<16xf32>
    %267 = vector.shape_cast %266 : vector<16xf32> to vector<16x1xf32>
    %cst_86 = arith.constant 3.200000e+01 : f32
    %268 = vector.broadcast %cst_86 : f32 to vector<16x1xf32>
    %269 = arith.divf %267, %268 : vector<16x1xf32>
    %270 = vector.broadcast %262 : vector<16x1xf32> to vector<16x32xf32>
    %271 = arith.subf %256, %270 : vector<16x32xf32>
    %cst_87 = arith.constant 9.99999974E-6 : f32
    %272 = vector.broadcast %cst_87 : f32 to vector<16x1xf32>
    %273 = arith.addf %269, %272 : vector<16x1xf32>
    %274 = math.rsqrt %273 : vector<16x1xf32>
    %275 = vector.broadcast %274 : vector<16x1xf32> to vector<16x32xf32>
    %276 = arith.mulf %271, %275 : vector<16x32xf32>
    %277 = vector.broadcast %257 : vector<1x32xf32> to vector<16x32xf32>
    %278 = arith.mulf %276, %277 : vector<16x32xf32>
    %279 = vector.broadcast %258 : vector<1x32xf32> to vector<16x32xf32>
    %280 = arith.addf %278, %279 : vector<16x32xf32>
    %281 = vector.shape_cast %280 : vector<16x32xf32> to vector<2x8x32xf32>
    %c0_88 = arith.constant 0 : index
    %c0_89 = arith.constant 0 : index
    %c0_90 = arith.constant 0 : index
    %282 = vector.load %arg10[%c0_88, %c0_89, %c0_90] : memref<2x8x32xf32, #tpu.memory_space<vmem>>, vector<2x8x32xf32>
    tpu.vector_store %arg10[%c0_88, %c0_89, %c0_90], %281 {strides = array<i32>} : memref<2x8x32xf32, #tpu.memory_space<vmem>>, vector<2x8x32xf32>,
    return
  }
  func.func @transform_0(%arg0: i32) -> (i32, i32, i32) {
    %c0_i32 = arith.constant 0 : i32
    %c0_i32_0 = arith.constant 0 : i32
    %c0_i32_1 = arith.constant 0 : i32
    return %arg0, %c0_i32, %c0_i32_0 : i32, i32, i32
  }
  func.func @transform_1(%arg0: i32) -> (i32, i32, i32) {
    %c0_i32 = arith.constant 0 : i32
    %c0_i32_0 = arith.constant 0 : i32
    %c0_i32_1 = arith.constant 0 : i32
    return %arg0, %c0_i32, %c0_i32_0 : i32, i32, i32
  }
  func.func @transform_2(%arg0: i32) -> (i32, i32, i32) {
    %c0_i32 = arith.constant 0 : i32
    %c0_i32_0 = arith.constant 0 : i32
    %c0_i32_1 = arith.constant 0 : i32
    return %arg0, %c0_i32, %c0_i32_0 : i32, i32, i32
  }
  func.func @transform_3(%arg0: i32) -> (i32, i32, i32) {
    %c0_i32 = arith.constant 0 : i32
    %c0_i32_0 = arith.constant 0 : i32
    %c0_i32_1 = arith.constant 0 : i32
    return %arg0, %c0_i32, %c0_i32_0 : i32, i32, i32
  }
  func.func @transform_4(%arg0: i32) -> (i32, i32, i32) {
    %c0_i32 = arith.constant 0 : i32
    %c0_i32_0 = arith.constant 0 : i32
    %c0_i32_1 = arith.constant 0 : i32
    %c0_i32_2 = arith.constant 0 : i32
    return %c0_i32, %c0_i32_0, %c0_i32_1 : i32, i32, i32
  }
  func.func @transform_5(%arg0: i32) -> (i32, i32, i32) {
    %c0_i32 = arith.constant 0 : i32
    %c0_i32_0 = arith.constant 0 : i32
    %c0_i32_1 = arith.constant 0 : i32
    %c0_i32_2 = arith.constant 0 : i32
    return %c0_i32, %c0_i32_0, %c0_i32_1 : i32, i32, i32
  }
  func.func @transform_6(%arg0: i32) -> (i32, i32) {
    %c0_i32 = arith.constant 0 : i32
    %c0_i32_0 = arith.constant 0 : i32
    %c0_i32_1 = arith.constant 0 : i32
    return %c0_i32, %c0_i32_0 : i32, i32
  }
  func.func @transform_7(%arg0: i32) -> (i32, i32) {
    %c0_i32 = arith.constant 0 : i32
    %c0_i32_0 = arith.constant 0 : i32
    %c0_i32_1 = arith.constant 0 : i32
    return %c0_i32, %c0_i32_0 : i32, i32
  }
  func.func @transform_8(%arg0: i32) -> (i32, i32) {
    %c0_i32 = arith.constant 0 : i32
    %c0_i32_0 = arith.constant 0 : i32
    %c0_i32_1 = arith.constant 0 : i32
    return %c0_i32, %c0_i32_0 : i32, i32
  }
  func.func @transform_9(%arg0: i32) -> (i32, i32, i32) {
    %c0_i32 = arith.constant 0 : i32
    %c0_i32_0 = arith.constant 0 : i32
    %c0_i32_1 = arith.constant 0 : i32
    return %arg0, %c0_i32, %c0_i32_0 : i32, i32, i32
  }
}

</mosaic_0001>

<bundles_post_ra>
// kernel: tpu_custom_call.1
= control target key start
LH: loop header
LB: loop body
LE: loop exit
PB: predicated region body
PF: predicated region fallthrough
CT: control target
= control target key end

     0   :  { %s2381_s0 = inlined_call_operand.vmem [shape: f32[2,8,32], index: 0, kind: input, shape index: {}]   ;;  %s2382_s1 = inlined_call_operand.vmem [shape: f32[2,8,32], index: 1, kind: input, shape index: {}]   ;;  %s2383_s2 = inlined_call_operand.vmem [shape: f32[2,8,8], index: 2, kind: input, shape index: {}]   ;;  %s2384_s3 = inlined_call_operand.vmem [shape: f32[2,1,8], index: 3, kind: input, shape index: {}]   ;;  %s2385_s4 = inlined_call_operand.vmem [shape: f32[2,32,128], index: 4, kind: input, shape index: {}]   ;;  %s2386_s5 = inlined_call_operand.vmem [shape: f32[2,1,128], index: 5, kind: input, shape index: {}]   ;;  %s2387_s6 = inlined_call_operand.vmem [shape: f32[32,128], index: 6, kind: input, shape index: {}]   ;;  %s2388_s7 = inlined_call_operand.vmem [shape: f32[128,32], index: 7, kind: input, shape index: {}]   ;;  %s2389_s8 = inlined_call_operand.vmem [shape: f32[8,128], index: 8, kind: input, shape index: {}]   ;;  %s2390_s9 = inlined_call_operand.hbm [shape: f32[2,8,32], index: 9, kind: output, shape index: {}]  }
   0x1   :  { %v1910_v0 = vld [vmem:[%s2385_s4 + $0x18] sm:$0xff]  ;;  %v1915_v1 = vld [vmem:[%s2385_s4 + $0x10] sm:$0xff]  ;;  %v1923_v3 = vld [vmem:[%s2385_s4 + $0x8] sm:$0xff] }
   0x2   :  { %77 = vmatpush.msra.mxu0 %v1910_v0  ;;  %v1702_v2 = vpack.i.bf16 %v1915_v1, %v1910_v0  ;;  %v1928_v4 = vld [vmem:[%s2385_s4] sm:$0xff] }
   0x3   :  { %v1707_v5 = vpack.i.bf16 %v1928_v4, %v1923_v3 }
   0x4   :  { %78 = vmatpush.msra.mxu0 %v1915_v1 }
   0x5   :  { %14 = vsyncpa [#allocation3], 0  ;;  %v1937_v6 = vld [vmem:[%s2381_s0] sm:$0xff]  ;;  %vm58_vm0 = vcmask 261120   ;;  %v1945_v7 = vld [vmem:[%s2381_s0 + $0x8] sm:$0xff]  ;;  %s1838_s23 = smov 88  }
   0x6   :  { %79 = vmatpush.msra.mxu0 %v1923_v3  ;;  %v1952_v8 = vld [vmem:[%s2386_s5] ss:$0 sm:$0xff]  ;;  %s1839_s24 = smov 96   ;;  %s1840_s0 = smov 112   ;;  %vm91_vm1 = vcmask 64512   ;;  %v1844_v20 = vmov 0.0  }
   0x7   :  { %s1841_s25 = smov 64   ;;  %s1842_s26 = smov 80   ;;  %v38_v19 = vld [vmem:[%s2383_s2] sm:$0xff]  ;;  %v39_v25 = vld [vmem:[%s2383_s2 + $0x8] sm:$0xff]  ;;  %vm633_vm4 = vcmask 130048   ;;  %vm636_vm5 = vcmask 195584  }
   0x8   :  { %80 = vmatpush.msra.mxu0 %v1928_v4  ;;  %s1843_s27 = smov 104   ;;  %vm40_vm2 = vcmp.eq.f32.partialorder %v38_v19, 0.0  ;;  %vm41_vm3 = vcmp.eq.f32.partialorder %v39_v25, 0.0  ;;  %s1845_s11 = smov 120  }
   0x9   :  { %1618 = vmatmul.msk.f32.vlgmr.msra.gmra.mxu0 %vm58_vm0, %v1937_v6  ;;  %v1989_v21 = vsel %vm40_vm2, -1e+30, %v1844_v20  ;;  %v1997_v26 = vsel %vm41_vm3, -1e+30, %v1844_v20  ;;  %s1846_s12 = smov 72   ;;  %s1847_s2 = smov 48  }
   0xa   :  { %s1848_s13 = smov 56   ;;  %s1849_s14 = smov 40  }
   0xb   :  { %s1850_s15 = smov 32   ;;  %s1851_s16 = smov 8  }
   0xc   :  { %s1852_s17 = smov 16   ;;  %s1853_s18 = smov 24  }
   0xd   :  { %s1606_s10 = sshll.u32 %s2390_s9, 4  ;;  %s1856_s19 = smov 128   ;;  %s1607_s10 = int_to_ptr.hbm [resolvable:$true] %s1606_s10 }
  0x11   :  { %1619 = vmatmul.msk.f32.gmra.mxu0 %vm58_vm0, %v1945_v7 }
  0x86   :  { %v82_v9 = vpop.f32.mrf.mxu0 }
  0x87   :  { %v1955_v10 = vadd.f32 %v1952_v8, %v82_v9 }
  0x89   :  { %219 = vrot.lane.b32.xlu2 %v1955_v10, %s1838_s23  ;;  %89 = vrot.lane.b32.xlu0 %v1955_v10, %s1839_s24 }
  0x8e   :  { %v85_v11 = vpop.f32.mrf.mxu0 }
  0x8f   :  { %v1962_v12 = vadd.f32 %v1952_v8, %v85_v11 }
  0x91   :  { %347 = vrot.lane.b32.xlu2 %v1955_v10, %s1840_s0  ;;  %117 = vrot.lane.b32.xlu0 %v1962_v12, %s1839_s24 }
  0x99   :  { %165 = vrot.lane.b32.xlu2 %v1955_v10, %s1841_s25  ;;  %349 = vrot.lane.b32.xlu0 %v1955_v10, %s1842_s26 }
  0xa1   :  { %477 = vrot.lane.b32.xlu2 %v1955_v10, %s1843_s27 }
  0xa9   :  { %247 = vrot.lane.b32.xlu2 %v1962_v12, %s1838_s23 }
  0xe3   :  { %v220_v13 = vpop.permute.xlu2 %219 }
  0xeb   :  { %v348_v14 = vpop.permute.xlu2 %347 }
  0xf3   :  { %v166_v15 = vpop.permute.xlu2 %165 }
  0xf4   :  { %186 = vmatpush.msra.mxu3 %v166_v15 }
  0xfb   :  { %v90_v16 = vpop.permute.xlu0 %89  ;;  %v478_v42 = vpop.permute.xlu2 %477 }
  0xfc   :  { %1620 = vmatpush.xpose.msk.msra.mxu1 %vm91_vm1, %v90_v16 }
  0xff   :  { %1621 = vmatmul.msk.f32.vlgmr.msra.gmra.mxu1 %vm91_vm1, %v1955_v10 }
 0x100   :  { %1626 = vmatpush.xpose.msk.msrb.mxu1 %vm91_vm1, %v220_v13 }
 0x103   :  { %v118_v17 = vpop.permute.xlu0 %117  ;;  %v248_v47 = vpop.permute.xlu2 %247 }
 0x104   :  { %1622 = vmatpush.xpose.msk.msra.mxu2 %vm91_vm1, %v118_v17 }
 0x107   :  { %1623 = vmatmul.msk.f32.vlgmr.msra.gmra.mxu2 %vm91_vm1, %v1962_v12 }
 0x10b   :  { %v350_v18 = vpop.permute.xlu0 %349 }
 0x10c   :  { %1632 = vmatpush.xpose.msk.msrb.mxu2 %vm91_vm1, %v350_v18 }
 0x10f   :  { %1633 = vmatmul.msk.f32.vlgmr.msrb.gmra.mxu2 %vm91_vm1, %v348_v14 }
 0x17c   :  { %v113_v22 = vpop.f32.mrf.mxu1 }
 0x17d   :  { %v114_v23 = vadd.f32 %v113_v22, %v1989_v21 }
 0x17f   :  { %v143_v24 = vsel %vm91_vm1, %v114_v23, -inf }
 0x180   :  { %144 = vmax.xlane.f32.xlu1 %v143_v24 }
 0x18a   :  { %v140_v27 = vpop.f32.mrf.mxu2 }
 0x18b   :  { %v141_v28 = vadd.f32 %v140_v27, %v1997_v26 }
 0x18d   :  { %v146_v29 = vsel %vm91_vm1, %v141_v28, -inf }
 0x18e   :  { %147 = vmax.xlane.f32.xlu1 %v146_v29 }
 0x192   :  { %v372_v44 = vpop.f32.mrf.mxu2 }
 0x193   :  { %v373_v45 = vadd.f32 %v372_v44, %v1989_v21 }
 0x195   :  { %v403_v46 = vsel %vm91_vm1, %v373_v45, -inf }
 0x1a7   :  { %217 = vrot.lane.b32.xlu1 %v1955_v10, %s1845_s11 }
 0x1af   :  { %479 = vrot.lane.b32.xlu1 %v1955_v10, %s1846_s12 }
 0x1b7   :  { %191 = vrot.lane.b32.xlu1 %v1962_v12, %s1841_s25 }
 0x1bf   :  { %245 = vrot.lane.b32.xlu1 %v1962_v12, %s1845_s11 }
 0x1c7   :  { %375 = vrot.lane.b32.xlu1 %v1962_v12, %s1840_s0 }
 0x1f3   :  { %v145_v30 = vpop.xlane.xlu1 %144 }
 0x1f4   :  { %v149_v31 = vsub.f32 %v114_v23, %v145_v30 }
 0x1f6   :  { %v151_v32 = vmul.f32 1.442695, %v149_v31 }
 0x1f8   :  { %1734 = vpow2.f32 %v151_v32 }
 0x1fe   :  { %v1735_v33 = vpop.eup %1734 }
 0x1ff   :  { %v155_v34 = vsel %vm91_vm1, %v1735_v33, 0.0 }
 0x200   :  { %156 = vadd.xlane.f32.xlu2 %v155_v34 }
 0x201   :  { %v148_v35 = vpop.xlane.xlu1 %147 }
 0x202   :  { %v150_v36 = vsub.f32 %v141_v28, %v148_v35 }
 0x204   :  { %v153_v37 = vmul.f32 1.442695, %v150_v36 }
 0x206   :  { %1736 = vpow2.f32 %v153_v37 }
 0x20c   :  { %v1737_v38 = vpop.eup %1736 }
 0x20d   :  { %v158_v39 = vsel %vm91_vm1, %v1737_v38, 0.0 }
 0x20e   :  { %159 = vadd.xlane.f32.xlu0 %v158_v39 }
 0x218   :  { %377 = vrot.lane.b32.xlu2 %v1962_v12, %s1842_s26 }
 0x219   :  { %v218_v40 = vpop.permute.xlu1 %217 }
 0x21a   :  { %1627 = vmatmul.msk.f32.vlgmr.msrb.gmra.mxu1 %vm91_vm1, %v218_v40 }
 0x220   :  { %505 = vrot.lane.b32.xlu2 %v1962_v12, %s1843_s27 }
 0x221   :  { %v480_v41 = vpop.permute.xlu1 %479 }
 0x222   :  { %507 = vrot.lane.b32.xlu0 %v1962_v12, %s1846_s12  ;;  %1638 = vmatpush.xpose.msk.msra.mxu2 %vm91_vm1, %v480_v41 }
 0x225   :  { %1639 = vmatmul.msk.f32.vlgmr.msra.gmra.mxu2 %vm91_vm1, %v478_v42 }
 0x229   :  { %v192_v43 = vpop.permute.xlu1 %191 }
 0x22a   :  { %212 = vmatpush.msrb.mxu3 %v192_v43 }
 0x231   :  { %v246_v49 = vpop.permute.xlu1 %245 }
 0x239   :  { %v376_v53 = vpop.permute.xlu1 %375 }
 0x249   :  { %404 = vmax.xlane.f32.xlu2 %v403_v46 }
 0x273   :  { %v157_v48 = vpop.xlane.xlu2 %156 }
 0x274   :  { %1738 = vrcp.f32 %v157_v48 }
 0x27a   :  { %v1739_v50 = vpop.eup %1738 }
 0x27b   :  { %v378_v51 = vpop.permute.xlu2 %377  ;;  %v163_v52 = vmul.f32 %v1739_v50, %v1735_v33 }
 0x27c   :  { %1634 = vmatpush.xpose.msk.msrb.mxu0 %vm91_vm1, %v378_v51 }
 0x27d   :  { %1624 = vmatmul.msk.f32.vlgmr.msra.gmra.mxu3 %vm91_vm1, %v163_v52 }
 0x27e   :  { %1628 = vmatpush.xpose.msk.msra.mxu3 %vm91_vm1, %v248_v47 }
 0x27f   :  { %1635 = vmatmul.msk.f32.vlgmr.msrb.gmra.mxu0 %vm91_vm1, %v376_v53 }
 0x281   :  { %v160_v54 = vpop.xlane.xlu0 %159 }
 0x282   :  { %1740 = vrcp.f32 %v160_v54 }
 0x283   :  { %v506_v58 = vpop.permute.xlu2 %505 }
 0x288   :  { %v1741_v55 = vpop.eup %1740 }
 0x289   :  { %v164_v56 = vmul.f32 %v1741_v55, %v1737_v38 }
 0x28b   :  { %1625 = vmatmul.msk.f32.vlgmr.msrb.gmra.mxu3 %vm91_vm1, %v164_v56 }
 0x293   :  { %1629 = vmatmul.msk.f32.vlgmr.msra.gmra.mxu3 %vm91_vm1, %v246_v49 }
 0x294   :  { %v508_v57 = vpop.permute.xlu0 %507 }
 0x295   :  { %1640 = vmatpush.xpose.msk.msra.mxu0 %vm91_vm1, %v508_v57 }
 0x297   :  { %v242_v59 = vpop.f32.mrf.mxu1 }
 0x298   :  { %v243_v60 = vadd.f32 %v242_v59, %v1989_v21  ;;  %1641 = vmatmul.msk.f32.vlgmr.msra.gmra.mxu0 %vm91_vm1, %v506_v58 }
 0x29a   :  { %v273_v61 = vsel %vm91_vm1, %v243_v60, -inf }
 0x29b   :  { %274 = vmax.xlane.f32.xlu1 %v273_v61 }
 0x2a8   :  { %v502_v62 = vpop.f32.mrf.mxu2 }
 0x2a9   :  { %v503_v63 = vadd.f32 %v502_v62, %v1989_v21 }
 0x2ab   :  { %v533_v9 = vsel %vm91_vm1, %v503_v63, -inf }
 0x2ac   :  { %534 = vmax.xlane.f32.xlu0 %v533_v9 }
 0x2bc   :  { %v405_v11 = vpop.xlane.xlu2 %404 }
 0x2bd   :  { %v409_v13 = vsub.f32 %v373_v45, %v405_v11 }
 0x2bf   :  { %v411_v14 = vmul.f32 1.442695, %v409_v13 }
 0x2c1   :  { %1742 = vpow2.f32 %v411_v14 }
 0x2c7   :  { %v2038_v18 = vpop.eup %1742 }
 0x2c8   :  { %v415_v21 = vsel %vm91_vm1, %v2038_v18, 0.0 }
 0x2fc   :  { %v400_v15 = vpop.f32.mrf.mxu0 }
 0x2fd   :  { %v401_v16 = vadd.f32 %v400_v15, %v1997_v26 }
 0x2ff   :  { %v406_v17 = vsel %vm91_vm1, %v401_v16, -inf }
 0x300   :  { %407 = vmax.xlane.f32.xlu2 %v406_v17  ;;  %v2040_v19 = vpop.f32.mrf.mxu3 }
 0x308   :  { %416 = vadd.xlane.f32.xlu2 %v415_v21 }
 0x30e   :  { %v275_v22 = vpop.xlane.xlu1 %274  ;;  %v2044_v24 = vpop.f32.mrf.mxu3 }
 0x30f   :  { %v279_v23 = vsub.f32 %v243_v60, %v275_v22 }
 0x311   :  { %v281_v25 = vmul.f32 1.442695, %v279_v23 }
 0x313   :  { %1744 = vpow2.f32 %v281_v25 }
 0x315   :  { %v530_v27 = vpop.f32.mrf.mxu0 }
 0x316   :  { %v531_v28 = vadd.f32 %v530_v27, %v1997_v26  ;;  %v270_v31 = vpop.f32.mrf.mxu3 }
 0x317   :  { %v271_v33 = vadd.f32 %v270_v31, %v1997_v26 }
 0x318   :  { %v536_v29 = vsel %vm91_vm1, %v531_v28, -inf }
 0x319   :  { %v1745_v30 = vpop.eup %1744  ;;  %537 = vmax.xlane.f32.xlu1 %v536_v29  ;;  %v276_v36 = vsel %vm91_vm1, %v271_v33, -inf }
 0x31a   :  { %v285_v32 = vsel %vm91_vm1, %v1745_v30, 0.0 }
 0x31b   :  { %286 = vadd.xlane.f32.xlu0 %v285_v32 }
 0x31f   :  { %v535_v34 = vpop.xlane.xlu0 %534 }
 0x320   :  { %v539_v35 = vsub.f32 %v503_v63, %v535_v34  ;;  %425 = vrot.lane.b32.xlu2 %v1955_v10, %s1847_s2 }
 0x321   :  { %277 = vmax.xlane.f32.xlu1 %v276_v36 }
 0x322   :  { %v541_v37 = vmul.f32 1.442695, %v539_v35 }
 0x324   :  { %1746 = vpow2.f32 %v541_v37 }
 0x32a   :  { %v1747_v38 = vpop.eup %1746 }
 0x32b   :  { %v545_v39 = vsel %vm91_vm1, %v1747_v38, 0.0 }
 0x32c   :  { %546 = vadd.xlane.f32.xlu0 %v545_v39 }
 0x33a   :  { %295 = vrot.lane.b32.xlu1 %v1955_v10, %s1848_s13 }
 0x340   :  { %555 = vrot.lane.b32.xlu0 %v1955_v10, %s1849_s14 }
 0x348   :  { %321 = vrot.lane.b32.xlu0 %v1962_v12, %s1848_s13 }
 0x373   :  { %v408_v26 = vpop.xlane.xlu2 %407 }
 0x374   :  { %v410_v40 = vsub.f32 %v401_v16, %v408_v26 }
 0x376   :  { %v413_v41 = vmul.f32 1.442695, %v410_v40 }
 0x378   :  { %1748 = vpow2.f32 %v413_v41 }
 0x37b   :  { %v417_v54 = vpop.xlane.xlu2 %416 }
 0x37e   :  { %v1749_v42 = vpop.eup %1748 }
 0x37f   :  { %v418_v43 = vsel %vm91_vm1, %v1749_v42, 0.0 }
 0x380   :  { %419 = vadd.xlane.f32.xlu2 %v418_v43 }
 0x383   :  { %v426_v59 = vpop.permute.xlu2 %425 }
 0x38c   :  { %v538_v44 = vpop.xlane.xlu1 %537 }
 0x38d   :  { %v540_v45 = vsub.f32 %v531_v28, %v538_v44 }
 0x38e   :  { %v287_v52 = vpop.xlane.xlu0 %286 }
 0x38f   :  { %v543_v46 = vmul.f32 1.442695, %v540_v45 }
 0x391   :  { %1750 = vpow2.f32 %v543_v46 }
 0x394   :  { %v278_v47 = vpop.xlane.xlu1 %277 }
 0x395   :  { %v280_v48 = vsub.f32 %v271_v33, %v278_v47  ;;  %v1854_v47 = vmov 32.0  }
 0x397   :  { %v1751_v49 = vpop.eup %1750  ;;  %v283_v50 = vmul.f32 1.442695, %v280_v48  ;;  %v2110_v48 = vld [vmem:[%s2385_s4 + $0x30] sm:$0xff] }
 0x398   :  { %581 = vrot.lane.b32.xlu2 %v1962_v12, %s1849_s14  ;;  %v548_v10 = vsel %vm91_vm1, %v1751_v49, 0.0 }
 0x399   :  { %1752 = vpow2.f32 %v283_v50  ;;  %549 = vadd.xlane.f32.xlu0 %v548_v10  ;;  %v2124_v50 = vld [vmem:[%s2385_s4 + $0x20] sm:$0xff] }
 0x39a   :  { %1754 = vrcp.f32 %v287_v52  ;;  %v35_v10 = vld [vmem:[%s2382_s1] sm:$0xff] }
 0x39b   :  { %1756 = vrcp.f32 %v417_v54 }
 0x39f   :  { %v1753_v51 = vpop.eup %1752  ;;  %v547_v56 = vpop.xlane.xlu0 %546 }
 0x3a0   :  { %v288_v53 = vsel %vm91_vm1, %v1753_v51, 0.0  ;;  %v1755_v55 = vpop.eup %1754  ;;  %1758 = vrcp.f32 %v547_v56  ;;  %1708 = vrot.lane.b32.xlu2 %v1707_v5, %s1850_s15 }
 0x3a1   :  { %289 = vadd.xlane.f32.xlu1 %v288_v53  ;;  %v293_v57 = vmul.f32 %v1755_v55, %v1745_v30  ;;  %v1757_v60 = vpop.eup %1756 }
 0x3a2   :  { %v423_v62 = vmul.f32 %v1757_v60, %v2038_v18 }
 0x3a6   :  { %v1759_v63 = vpop.eup %1758 }
 0x3a7   :  { %v553_v11 = vmul.f32 %v1759_v63, %v1747_v38 }
 0x3ac   :  { %v296_v58 = vpop.permute.xlu1 %295 }
 0x3ad   :  { %316 = vmatpush.msrb.mxu3 %v296_v58  ;;  %1703 = vrot.lane.b32.xlu0 %v1702_v2, %s1850_s15 }
 0x3ae   :  { %1630 = vmatmul.msk.f32.vlgmr.msrb.gmra.mxu3 %vm91_vm1, %v293_v57 }
 0x3af   :  { %446 = vmatpush.msra.mxu3 %v426_v59 }
 0x3b2   :  { %v556_v61 = vpop.permute.xlu0 %555 }
 0x3b3   :  { %576 = vmatpush.msrb.mxu3 %v556_v61 }
 0x3b6   :  { %1636 = vmatmul.msk.f32.vlgmr.msra.gmra.mxu3 %vm91_vm1, %v423_v62 }
 0x3ba   :  { %451 = vrot.lane.b32.xlu1 %v1962_v12, %s1847_s2  ;;  %v322_v9 = vpop.permute.xlu0 %321 }
 0x3bb   :  { %342 = vmatpush.msra.mxu1 %v322_v9 }
 0x3be   :  { %1642 = vmatmul.msk.f32.vlgmr.msrb.gmra.mxu3 %vm91_vm1, %v553_v11  ;;  %v36_v11 = vld [vmem:[%s2382_s1 + $0x8] sm:$0xff] }
 0x3f3   :  { %v420_v0 = vpop.xlane.xlu2 %419 }
 0x3fb   :  { %v582_v5 = vpop.permute.xlu2 %581 }
 0x403   :  { %v1709_v27 = vpop.permute.xlu2 %1708 }
 0x404   :  { %v1711_v28 = vunpack.i.h.bf16 %v1709_v27  ;;  %v1710_v29 = vunpack.i.l.bf16 %v1709_v27 }
 0x40c   :  { %v550_v1 = vpop.xlane.xlu0 %549 }
 0x414   :  { %v290_v13 = vpop.xlane.xlu1 %289 }
 0x415   :  { %1760 = vrcp.f32 %v290_v13 }
 0x416   :  { %1762 = vrcp.f32 %v420_v0  ;;  %v2148_v0 = vld [vmem:[%s2386_s5 + $0x1] ss:$0 sm:$0xff] }
 0x417   :  { %1764 = vrcp.f32 %v550_v1 }
 0x418   :  { %1766 = vrcp.f32 %v1854_v47 }
 0x41b   :  { %v1761_v14 = vpop.eup %1760 }
 0x41c   :  { %v294_v15 = vmul.f32 %v1761_v14, %v1753_v51  ;;  %v1763_v2 = vpop.eup %1762 }
 0x41d   :  { %v424_v3 = vmul.f32 %v1763_v2, %v1749_v42  ;;  %v1765_v12 = vpop.eup %1764 }
 0x41e   :  { %1631 = vmatmul.msk.f32.vlgmr.msra.gmra.mxu1 %vm91_vm1, %v294_v15  ;;  %v554_v17 = vmul.f32 %v1765_v12, %v1751_v49  ;;  %v1767_v49 = vpop.eup %1766 }
 0x41f   :  { %v1704_v22 = vpop.permute.xlu0 %1703  ;;  %v696_v51 = vmul.f32 32.0, %v1767_v49  ;;  %vm700_vm6 = vweird.f32 %v1767_v49 }
 0x420   :  { %v1706_v23 = vunpack.i.h.bf16 %v1704_v22  ;;  %v1705_v25 = vunpack.i.l.bf16 %v1704_v22  ;;  %v2164_v22 = vld [vmem:[%s2389_s8] sm:$0xff] }
 0x421   :  { %v697_v52 = vsub.f32 1.0, %v696_v51  ;;  %v740_v27 = vperm.slane %v2164_v22, 2 }
 0x422   :  { %676 = vmatpush.msrb.mxu0 %v1705_v25 }
 0x423   :  { %v698_v53 = vmul.f32 %v1767_v49, %v697_v52 }
 0x424   :  { %677 = vmatpush.msrb.mxu0 %v1706_v23 }
 0x425   :  { %v699_v56 = vadd.f32 %v1767_v49, %v698_v53 }
 0x426   :  { %678 = vmatpush.msrb.mxu0 %v1710_v29 }
 0x427   :  { %v2136_v59 = vsel %vm700_vm6, %v1767_v49, %v699_v56 }
 0x428   :  { %679 = vmatpush.msrb.mxu0 %v1711_v28 }
 0x42c   :  { %v452_v4 = vpop.permute.xlu1 %451 }
 0x42d   :  { %472 = vmatpush.msrb.mxu1 %v452_v4 }
 0x42e   :  { %1637 = vmatmul.msk.f32.vlgmr.msrb.gmra.mxu1 %vm91_vm1, %v424_v3 }
 0x42f   :  { %602 = vmatpush.msra.mxu1 %v582_v5 }
 0x431   :  { %v318_v16 = vpop.f32.mrf.mxu3 }
 0x432   :  { %609 = vrot.lane.b32.xlu1 %v318_v16, %s1851_s16 }
 0x436   :  { %1643 = vmatmul.msk.f32.vlgmr.msra.gmra.mxu1 %vm91_vm1, %v554_v17 }
 0x439   :  { %v448_v18 = vpop.f32.mrf.mxu3 }
 0x43a   :  { %617 = vrot.lane.b32.xlu1 %v448_v18, %s1852_s17 }
 0x441   :  { %v578_v21 = vpop.f32.mrf.mxu3 }
 0x442   :  { %625 = vrot.lane.b32.xlu0 %v578_v21, %s1853_s18 }
 0x49b   :  { %v344_v30 = vpop.f32.mrf.mxu1 }
 0x49c   :  { %611 = vrot.lane.b32.xlu2 %v344_v30, %s1851_s16  ;;  %v743_v30 = vperm.slane %v2164_v22, 5 }
 0x4a4   :  { %655 = vrot.lane.b32.xlu2 %v1952_v8, %s1850_s15  ;;  %v610_v31 = vpop.permute.xlu1 %609 }
 0x4a5   :  { %v631_v34 = vsel %vm91_vm1, %v2040_v19, %v610_v31 }
 0x4ab   :  { %v474_v32 = vpop.f32.mrf.mxu1 }
 0x4ac   :  { %619 = vrot.lane.b32.xlu1 %v474_v32, %s1852_s17  ;;  %v618_v33 = vpop.permute.xlu1 %617 }
 0x4ad   :  { %v634_v36 = vsel %vm633_vm4, %v631_v34, %v618_v33 }
 0x4b3   :  { %v604_v35 = vpop.f32.mrf.mxu1 }
 0x4b4   :  { %627 = vrot.lane.b32.xlu0 %v604_v35, %s1853_s18  ;;  %v626_v37 = vpop.permute.xlu0 %625 }
 0x4b5   :  { %v637_v38 = vsel %vm636_vm5, %v634_v36, %v626_v37 }
 0x4b6   :  { %1644 = vmatmul.msk.f32.vlgmr.msrb.gmra.mxu0 %vm58_vm0, %v637_v38 }
 0x4f6   :  { %v612_v8 = vpop.permute.xlu2 %611 }
 0x4f7   :  { %v632_v26 = vsel %vm91_vm1, %v2044_v24, %v612_v8  ;;  %v2105_v24 = vld [vmem:[%s2385_s4 + $0x38] sm:$0xff] }
 0x4f8   :  { %803 = vmatpush.msra.mxu3 %v2105_v24  ;;  %774 = vmatpush.msra.mxu0 %v2105_v24 }
 0x4fa   :  { %804 = vmatpush.msra.mxu3 %v2110_v48  ;;  %775 = vmatpush.msra.mxu0 %v2110_v48 }
 0x4fe   :  { %v656_v42 = vpop.permute.xlu2 %655 }
 0x51e   :  { %v620_v39 = vpop.permute.xlu1 %619 }
 0x51f   :  { %v635_v40 = vsel %vm633_vm4, %v632_v26, %v620_v39 }
 0x526   :  { %v628_v41 = vpop.permute.xlu0 %627 }
 0x527   :  { %v638_v19 = vsel %vm636_vm5, %v635_v40, %v628_v41 }
 0x528   :  { %1645 = vmatmul.msk.f32.gmra.mxu0 %vm58_vm0, %v638_v19 }
 0x533   :  { %v681_v43 = vpop.f32.mrf.mxu0 }
 0x534   :  { %v682_v44 = vadd.f32 %v681_v43, %v656_v42 }
 0x536   :  { %v687_v45 = vadd.f32 %v682_v44, %v1937_v6  ;;  %v2117_v6 = vld [vmem:[%s2385_s4 + $0x28] sm:$0xff] }
 0x537   :  { %805 = vmatpush.msra.mxu3 %v2117_v6  ;;  %776 = vmatpush.msra.mxu0 %v2117_v6 }
 0x538   :  { %v689_v46 = vsel %vm58_vm0, %v687_v45, 0.0 }
 0x539   :  { %690 = vadd.xlane.f32.xlu1 %v689_v46  ;;  %806 = vmatpush.msra.mxu3 %v2124_v50 }
 0x53a   :  { %777 = vmatpush.msra.mxu0 %v2124_v50  ;;  %1653 = vmatmul.msk.f32.vlgmr.msra.gmra.mxu3 %vm58_vm0, %v35_v10 }
 0x542   :  { %1654 = vmatmul.msk.f32.gmra.mxu3 %vm58_vm0, %v36_v11 }
 0x5a5   :  { %v684_v54 = vpop.f32.mrf.mxu0 }
 0x5a6   :  { %v685_v55 = vadd.f32 %v684_v54, %v656_v42 }
 0x5a8   :  { %v688_v57 = vadd.f32 %v685_v55, %v1945_v7 }
 0x5aa   :  { %v692_v58 = vsel %vm58_vm0, %v688_v57, 0.0 }
 0x5ab   :  { %693 = vadd.xlane.f32.xlu0 %v692_v58  ;;  %v44_v58 = vld [vmem:[%s2384_s3] sm:$0x1] }
 0x5ac   :  { %v691_v60 = vpop.xlane.xlu1 %690  ;;  %vm46_vm13 = vcmp.eq.f32.partialorder %v44_v58, 0.0 }
 0x5ad   :  { %v702_v61 = vmul.f32 %v2136_v59, %v691_v60  ;;  %v48_v60 = vsel %vm46_vm13, -1e+30, %v1844_v20 }
 0x5af   :  { %v704_v62 = vsub.f32 %v687_v45, %v702_v61  ;;  %v816_v61 = vperm.slane %v48_v60, 0 }
 0x5b1   :  { %v706_v63 = vmul.f32 %v704_v62, %v704_v62 }
 0x5b3   :  { %v708_v9 = vsel %vm58_vm0, %v706_v63, 0.0 }
 0x5b4   :  { %709 = vadd.xlane.f32.xlu2 %v708_v9 }
 0x5bd   :  { %v808_v1 = vpop.f32.mrf.mxu3 }
 0x5be   :  { %v2152_v3 = vadd.f32 %v2148_v0, %v808_v1 }
 0x5c0   :  { %952 = vrot.lane.b32.xlu0 %v2152_v3, %s1838_s23 }
 0x5c5   :  { %v811_v37 = vpop.f32.mrf.mxu3 }
 0x5c6   :  { %v2175_v38 = vadd.f32 %v2148_v0, %v811_v37 }
 0x5c8   :  { %1082 = vrot.lane.b32.xlu0 %v2152_v3, %s1842_s26 }
 0x5cc   :  { %821 = vrot.lane.b32.xlu2 %v2152_v3, %s1839_s24 }
 0x5d0   :  { %849 = vrot.lane.b32.xlu0 %v2175_v38, %s1839_s24 }
 0x5d8   :  { %980 = vrot.lane.b32.xlu0 %v2175_v38, %s1838_s23 }
 0x61e   :  { %v694_v7 = vpop.xlane.xlu0 %693 }
 0x61f   :  { %v703_v13 = vmul.f32 %v2136_v59, %v694_v7 }
 0x621   :  { %v705_v14 = vsub.f32 %v688_v57, %v703_v13 }
 0x623   :  { %v707_v15 = vmul.f32 %v705_v14, %v705_v14 }
 0x625   :  { %v711_v2 = vsel %vm58_vm0, %v707_v15, 0.0 }
 0x626   :  { %712 = vadd.xlane.f32.xlu1 %v711_v2 }
 0x627   :  { %v710_v4 = vpop.xlane.xlu2 %709 }
 0x628   :  { %v714_v5 = vmul.f32 %v710_v4, %v2136_v59 }
 0x62a   :  { %v716_v12 = vadd.f32 1e-05, %v714_v5 }
 0x62c   :  { %1768 = vrsqrt.f32 %v716_v12  ;;  %vm724_vm8 = vweird.f32 %v716_v12 }
 0x62f   :  { %v822_v33 = vpop.permute.xlu2 %821 }
 0x630   :  { %1655 = vmatpush.xpose.msk.msrb.mxu1 %vm91_vm1, %v822_v33 }
 0x632   :  { %v1769_v16 = vpop.eup %1768  ;;  %v953_v49 = vpop.permute.xlu0 %952 }
 0x633   :  { %v719_v17 = vmul.f32 %v1769_v16, %v716_v12  ;;  %vm725_vm7 = vweird.f32 %v1769_v16  ;;  %1661 = vmatpush.xpose.msk.msrb.mxu3 %vm91_vm1, %v953_v49 }
 0x634   :  { %vm726_vm9 = vmor %vm724_vm8, %vm725_vm7 }
 0x635   :  { %v720_v18 = vmul.f32 %v1769_v16, %v719_v17 }
 0x637   :  { %v721_v21 = vmul.f32 0.5, %v720_v18 }
 0x639   :  { %v722_v23 = vsub.f32 1.5, %v721_v21 }
 0x63a   :  { %v1083_v10 = vpop.permute.xlu0 %1082 }
 0x63b   :  { %v723_v25 = vmul.f32 %v1769_v16, %v722_v23  ;;  %1667 = vmatpush.xpose.msk.msra.mxu3 %vm91_vm1, %v1083_v10 }
 0x63d   :  { %v727_v28 = vsel %vm726_vm9, %v1769_v16, %v723_v25 }
 0x63e   :  { %v738_v29 = vmul.f32 %v727_v28, %v704_v62  ;;  %v45_v28 = vld [vmem:[%s2384_s3 + $0x1] sm:$0x1] }
 0x63f   :  { %vm47_vm14 = vcmp.eq.f32.partialorder %v45_v28, 0.0 }
 0x640   :  { %v741_v31 = vmul.f32 %v740_v27, %v738_v29 }
 0x642   :  { %v2168_v32 = vadd.f32 %v743_v30, %v741_v31  ;;  %v850_v51 = vpop.permute.xlu0 %849  ;;  %v49_v31 = vsel %vm47_vm14, -1e+30, %v1844_v20 }
 0x643   :  { %1657 = vmatpush.xpose.msk.msra.mxu1 %vm91_vm1, %v850_v51 }
 0x644   :  { %1651 = vmatmul.msk.f32.vlgmr.msra.gmra.mxu0 %vm58_vm0, %v2168_v32 }
 0x64a   :  { %v981_v11 = vpop.permute.xlu0 %980 }
 0x699   :  { %v713_v34 = vpop.xlane.xlu1 %712 }
 0x69a   :  { %v715_v35 = vmul.f32 %v713_v34, %v2136_v59  ;;  %v817_v34 = vperm.slane %v49_v31, 0 }
 0x69c   :  { %v717_v36 = vadd.f32 1e-05, %v715_v35 }
 0x69e   :  { %1770 = vrsqrt.f32 %v717_v36  ;;  %vm734_vm11 = vweird.f32 %v717_v36 }
 0x6a4   :  { %v1771_v8 = vpop.eup %1770 }
 0x6a5   :  { %v729_v39 = vmul.f32 %v1771_v8, %v717_v36  ;;  %vm735_vm10 = vweird.f32 %v1771_v8 }
 0x6a6   :  { %vm736_vm12 = vmor %vm734_vm11, %vm735_vm10 }
 0x6a7   :  { %v730_v26 = vmul.f32 %v1771_v8, %v729_v39 }
 0x6a9   :  { %v731_v40 = vmul.f32 0.5, %v730_v26 }
 0x6ab   :  { %v732_v41 = vsub.f32 1.5, %v731_v40 }
 0x6ad   :  { %v733_v19 = vmul.f32 %v1771_v8, %v732_v41 }
 0x6af   :  { %v737_v42 = vsel %vm736_vm12, %v1771_v8, %v733_v19 }
 0x6b0   :  { %v739_v43 = vmul.f32 %v737_v42, %v705_v14 }
 0x6b2   :  { %v742_v44 = vmul.f32 %v740_v27, %v739_v43 }
 0x6b4   :  { %v2181_v45 = vadd.f32 %v743_v30, %v742_v44  ;;  %v1712_v30 = vpack.i.bf16 %v2175_v38, %v2152_v3 }
 0x6b6   :  { %1652 = vmatmul.msk.f32.gmra.mxu0 %vm58_vm0, %v2181_v45 }
 0x6c1   :  { %v779_v46 = vpop.f32.mrf.mxu0 }
 0x6c2   :  { %v780_v47 = vadd.f32 %v2148_v0, %v779_v46 }
 0x6c4   :  { %1080 = vrot.lane.b32.xlu2 %v780_v47, %s1840_s0  ;;  %950 = vrot.lane.b32.xlu1 %v780_v47, %s1845_s11 }
 0x6c5   :  { %1656 = vmatmul.msk.f32.vlgmr.msrb.gmra.mxu1 %vm91_vm1, %v780_v47 }
 0x6c6   :  { %1663 = vmatpush.xpose.msk.msrb.mxu1 %vm91_vm1, %v981_v11 }
 0x6cc   :  { %1210 = vrot.lane.b32.xlu2 %v780_v47, %s1843_s27  ;;  %1212 = vrot.lane.b32.xlu1 %v2152_v3, %s1846_s12 }
 0x6d4   :  { %1110 = vrot.lane.b32.xlu2 %v2175_v38, %s1842_s26 }
 0x71e   :  { %v1081_v55 = vpop.permute.xlu2 %1080 }
 0x726   :  { %v1211_v57 = vpop.permute.xlu2 %1210 }
 0x72e   :  { %v1111_v7 = vpop.permute.xlu2 %1110 }
 0x733   :  { %v782_v52 = vpop.f32.mrf.mxu0 }
 0x734   :  { %v783_v53 = vadd.f32 %v2148_v0, %v782_v52 }
 0x736   :  { %1238 = vrot.lane.b32.xlu2 %v783_v53, %s1843_s27  ;;  %1108 = vrot.lane.b32.xlu0 %v783_v53, %s1840_s0  ;;  %v951_v54 = vpop.permute.xlu1 %950 }
 0x737   :  { %978 = vrot.lane.b32.xlu1 %v783_v53, %s1845_s11  ;;  %1658 = vmatmul.msk.f32.vlgmr.msra.gmra.mxu1 %vm91_vm1, %v783_v53 }
 0x738   :  { %1662 = vmatmul.msk.f32.vlgmr.msrb.gmra.mxu3 %vm91_vm1, %v951_v54  ;;  %1669 = vmatpush.xpose.msk.msra.mxu1 %vm91_vm1, %v1111_v7 }
 0x73e   :  { %v1213_v56 = vpop.permute.xlu1 %1212 }
 0x73f   :  { %1673 = vmatpush.xpose.msk.msrb.mxu3 %vm91_vm1, %v1213_v56  ;;  %1240 = vrot.lane.b32.xlu1 %v2175_v38, %s1846_s12 }
 0x740   :  { %1668 = vmatmul.msk.f32.vlgmr.msra.gmra.mxu3 %vm91_vm1, %v1081_v55 }
 0x742   :  { %v845_v62 = vpop.f32.mrf.mxu1 }
 0x743   :  { %v846_v63 = vadd.f32 %v845_v62, %v816_v61 }
 0x745   :  { %v876_v9 = vsel %vm91_vm1, %v846_v63, -inf }
 0x748   :  { %1674 = vmatmul.msk.f32.vlgmr.msrb.gmra.mxu3 %vm91_vm1, %v1211_v57 }
 0x760   :  { %877 = vmax.xlane.f32.xlu0 %v876_v9 }
 0x790   :  { %v1239_v1 = vpop.permute.xlu2 %1238 }
 0x7a8   :  { %v1109_v14 = vpop.permute.xlu0 %1108 }
 0x7a9   :  { %v979_v13 = vpop.permute.xlu1 %978 }
 0x7aa   :  { %1664 = vmatmul.msk.f32.vlgmr.msrb.gmra.mxu1 %vm91_vm1, %v979_v13 }
 0x7b1   :  { %v1241_v15 = vpop.permute.xlu1 %1240 }
 0x7b2   :  { %1670 = vmatmul.msk.f32.vlgmr.msra.gmra.mxu1 %vm91_vm1, %v1109_v14 }
 0x7b3   :  { %1675 = vmatpush.xpose.msk.msrb.mxu1 %vm91_vm1, %v1241_v15 }
 0x7b4   :  { %v873_v36 = vpop.f32.mrf.mxu1 }
 0x7b5   :  { %v874_v37 = vadd.f32 %v873_v36, %v817_v34 }
 0x7b7   :  { %v879_v8 = vsel %vm91_vm1, %v874_v37, -inf }
 0x7ba   :  { %1676 = vmatmul.msk.f32.vlgmr.msrb.gmra.mxu1 %vm91_vm1, %v1239_v1 }
 0x7bb   :  { %v975_v2 = vpop.f32.mrf.mxu3 }
 0x7bc   :  { %v976_v4 = vadd.f32 %v975_v2, %v816_v61 }
 0x7be   :  { %v1006_v5 = vsel %vm91_vm1, %v976_v4, -inf }
 0x7bf   :  { %1007 = vmax.xlane.f32.xlu1 %v1006_v5 }
 0x7c3   :  { %v1105_v12 = vpop.f32.mrf.mxu3 }
 0x7c4   :  { %v1106_v16 = vadd.f32 %v1105_v12, %v816_v61 }
 0x7c6   :  { %v1136_v17 = vsel %vm91_vm1, %v1106_v16, -inf }
 0x7c7   :  { %1137 = vmax.xlane.f32.xlu0 %v1136_v17 }
 0x7cb   :  { %v1235_v18 = vpop.f32.mrf.mxu3 }
 0x7cc   :  { %v1236_v21 = vadd.f32 %v1235_v18, %v816_v61 }
 0x7ce   :  { %v1266_v23 = vsel %vm91_vm1, %v1236_v21, -inf }
 0x7cf   :  { %1267 = vmax.xlane.f32.xlu2 %v1266_v23 }
 0x7d3   :  { %v878_v25 = vpop.xlane.xlu0 %877 }
 0x7d4   :  { %v882_v27 = vsub.f32 %v846_v63, %v878_v25 }
 0x7d6   :  { %v884_v29 = vmul.f32 1.442695, %v882_v27 }
 0x7d8   :  { %1772 = vpow2.f32 %v884_v29  ;;  %1713 = vrot.lane.b32.xlu1 %v1712_v30, %s1841_s25 }
 0x7de   :  { %v1773_v33 = vpop.eup %1772 }
 0x7df   :  { %v888_v35 = vsel %vm91_vm1, %v1773_v33, 0.0 }
 0x7e0   :  { %889 = vadd.xlane.f32.xlu2 %v888_v35 }
 0x7e8   :  { %880 = vmax.xlane.f32.xlu2 %v879_v8 }
 0x800   :  { %1718 = vrot.lane.b32.xlu2 %v1712_v30, %s1848_s13 }
 0x827   :  { %v1003_v39 = vpop.f32.mrf.mxu1 }
 0x828   :  { %v1004_v26 = vadd.f32 %v1003_v39, %v817_v34 }
 0x82a   :  { %v1009_v40 = vsel %vm91_vm1, %v1004_v26, -inf }
 0x82b   :  { %1010 = vmax.xlane.f32.xlu1 %v1009_v40 }
 0x82f   :  { %v1133_v41 = vpop.f32.mrf.mxu1 }
 0x830   :  { %v1134_v58 = vadd.f32 %v1133_v41, %v817_v34 }
 0x832   :  { %v1008_v19 = vpop.xlane.xlu1 %1007  ;;  %v1139_v63 = vsel %vm91_vm1, %v1134_v58, -inf }
 0x833   :  { %v1012_v20 = vsub.f32 %v976_v4, %v1008_v19 }
 0x835   :  { %v1014_v42 = vmul.f32 1.442695, %v1012_v20 }
 0x837   :  { %1774 = vpow2.f32 %v1014_v42  ;;  %v1263_v43 = vpop.f32.mrf.mxu1 }
 0x838   :  { %v1264_v44 = vadd.f32 %v1263_v43, %v817_v34 }
 0x83a   :  { %v1138_v46 = vpop.xlane.xlu0 %1137  ;;  %v1269_v47 = vsel %vm91_vm1, %v1264_v44, -inf }
 0x83b   :  { %v1142_v49 = vsub.f32 %v1106_v16, %v1138_v46  ;;  %1270 = vmax.xlane.f32.xlu1 %v1269_v47 }
 0x83d   :  { %v1775_v10 = vpop.eup %1774  ;;  %v1144_v51 = vmul.f32 1.442695, %v1142_v49 }
 0x83e   :  { %v1018_v52 = vsel %vm91_vm1, %v1775_v10, 0.0 }
 0x83f   :  { %1776 = vpow2.f32 %v1144_v51  ;;  %1019 = vadd.xlane.f32.xlu0 %v1018_v52  ;;  %v1722_v51 = vpack.i.bf16 %v2110_v48, %v2105_v24 }
 0x842   :  { %v1268_v53 = vpop.xlane.xlu2 %1267 }
 0x843   :  { %v1272_v55 = vsub.f32 %v1236_v21, %v1268_v53 }
 0x845   :  { %v1777_v54 = vpop.eup %1776  ;;  %v1274_v57 = vmul.f32 1.442695, %v1272_v55 }
 0x846   :  { %v1148_v56 = vsel %vm91_vm1, %v1777_v54, 0.0 }
 0x847   :  { %1149 = vadd.xlane.f32.xlu0 %v1148_v56  ;;  %1778 = vpow2.f32 %v1274_v57 }
 0x84a   :  { %v1714_v60 = vpop.permute.xlu1 %1713 }
 0x84b   :  { %v1716_v61 = vunpack.i.h.bf16 %v1714_v60  ;;  %v1715_v62 = vunpack.i.l.bf16 %v1714_v60 }
 0x84d   :  { %919 = vmatpush.msrb.mxu2 %v1715_v62  ;;  %945 = vmatpush.msrb.mxu0 %v1716_v61  ;;  %v1779_v9 = vpop.eup %1778 }
 0x84e   :  { %v1278_v7 = vsel %vm91_vm1, %v1779_v9, 0.0 }
 0x84f   :  { %1140 = vmax.xlane.f32.xlu0 %v1139_v63 }
 0x853   :  { %v890_v11 = vpop.xlane.xlu2 %889 }
 0x854   :  { %1780 = vrcp.f32 %v890_v11  ;;  %1158 = vrot.lane.b32.xlu1 %v2152_v3, %s1847_s2 }
 0x857   :  { %1279 = vadd.xlane.f32.xlu0 %v1278_v7 }
 0x85a   :  { %v1781_v13 = vpop.eup %1780 }
 0x85b   :  { %v896_v14 = vmul.f32 %v1781_v13, %v1773_v33  ;;  %v881_v15 = vpop.xlane.xlu2 %880 }
 0x85c   :  { %v883_v1 = vsub.f32 %v874_v37, %v881_v15 }
 0x85d   :  { %1659 = vmatmul.msk.f32.vlgmr.msrb.gmra.mxu2 %vm91_vm1, %v896_v14 }
 0x85e   :  { %v886_v2 = vmul.f32 1.442695, %v883_v1 }
 0x860   :  { %1782 = vpow2.f32 %v886_v2 }
 0x863   :  { %v1719_v4 = vpop.permute.xlu2 %1718 }
 0x864   :  { %v1721_v5 = vunpack.i.h.bf16 %v1719_v4  ;;  %v1720_v12 = vunpack.i.l.bf16 %v1719_v4 }
 0x866   :  { %v1783_v16 = vpop.eup %1782  ;;  %1049 = vmatpush.msra.mxu2 %v1720_v12  ;;  %1075 = vmatpush.msra.mxu0 %v1721_v5 }
 0x867   :  { %v891_v17 = vsel %vm91_vm1, %v1783_v16, 0.0 }
 0x868   :  { %892 = vadd.xlane.f32.xlu2 %v891_v17 }
 0x880   :  { %1288 = vrot.lane.b32.xlu2 %v2152_v3, %s1849_s14 }
 0x888   :  { %1314 = vrot.lane.b32.xlu2 %v2175_v38, %s1849_s14 }
 0x890   :  { %1723 = vrot.lane.b32.xlu2 %v1722_v51, %s1850_s15 }
 0x89e   :  { %v1011_v18 = vpop.xlane.xlu1 %1010 }
 0x89f   :  { %v1013_v21 = vsub.f32 %v1004_v26, %v1011_v18 }
 0x8a1   :  { %v1016_v23 = vmul.f32 1.442695, %v1013_v21 }
 0x8a3   :  { %1784 = vpow2.f32 %v1016_v23 }
 0x8a9   :  { %v1785_v25 = vpop.eup %1784 }
 0x8aa   :  { %v1021_v27 = vsel %vm91_vm1, %v1785_v25, 0.0 }
 0x8ab   :  { %1022 = vadd.xlane.f32.xlu0 %v1021_v27 }
 0x8ae   :  { %v1271_v28 = vpop.xlane.xlu1 %1270 }
 0x8af   :  { %v1273_v29 = vsub.f32 %v1264_v44, %v1271_v28 }
 0x8b1   :  { %v1276_v30 = vmul.f32 1.442695, %v1273_v29 }
 0x8b2   :  { %v1020_v31 = vpop.xlane.xlu0 %1019 }
 0x8b3   :  { %1786 = vpow2.f32 %v1276_v30 }
 0x8b4   :  { %1788 = vrcp.f32 %v1020_v31 }
 0x8b9   :  { %v1787_v33 = vpop.eup %1786 }
 0x8ba   :  { %v1789_v34 = vpop.eup %1788  ;;  %v1150_v3 = vpop.xlane.xlu0 %1149  ;;  %v1281_v35 = vsel %vm91_vm1, %v1787_v33, 0.0 }
 0x8bb   :  { %v1026_v36 = vmul.f32 %v1789_v34, %v1775_v10  ;;  %1282 = vadd.xlane.f32.xlu1 %v1281_v35  ;;  %1790 = vrcp.f32 %v1150_v3 }
 0x8bd   :  { %1665 = vmatmul.msk.f32.vlgmr.msra.gmra.mxu2 %vm91_vm1, %v1026_v36 }
 0x8c1   :  { %v1791_v8 = vpop.eup %1790 }
 0x8c2   :  { %v1141_v37 = vpop.xlane.xlu0 %1140  ;;  %v1156_v40 = vmul.f32 %v1791_v8, %v1777_v54 }
 0x8c3   :  { %v1143_v39 = vsub.f32 %v1134_v58, %v1141_v37 }
 0x8c5   :  { %v1146_v26 = vmul.f32 1.442695, %v1143_v39 }
 0x8c6   :  { %v1159_v41 = vpop.permute.xlu1 %1158 }
 0x8c7   :  { %1792 = vpow2.f32 %v1146_v26  ;;  %1179 = vmatpush.msrb.mxu2 %v1159_v41 }
 0x8c8   :  { %1671 = vmatmul.msk.f32.vlgmr.msrb.gmra.mxu2 %vm91_vm1, %v1156_v40 }
 0x8ca   :  { %v1280_v42 = vpop.xlane.xlu0 %1279 }
 0x8cb   :  { %1794 = vrcp.f32 %v1280_v42 }
 0x8cd   :  { %v1793_v19 = vpop.eup %1792 }
 0x8ce   :  { %v1151_v20 = vsel %vm91_vm1, %v1793_v19, 0.0 }
 0x8cf   :  { %1152 = vadd.xlane.f32.xlu0 %v1151_v20 }
 0x8d1   :  { %v1795_v44 = vpop.eup %1794 }
 0x8d2   :  { %v1286_v47 = vmul.f32 %v1795_v44, %v1779_v9 }
 0x8db   :  { %v893_v43 = vpop.xlane.xlu2 %892 }
 0x8dc   :  { %1796 = vrcp.f32 %v893_v43  ;;  %v1471_v43 = vld [vmem:[%s2387_s6 + $0x8] sm:$0xff] }
 0x8e0   :  { %v921_v55 = vpop.f32.mrf.mxu2 }
 0x8e2   :  { %v1797_v46 = vpop.eup %1796 }
 0x8e3   :  { %v897_v49 = vmul.f32 %v1797_v46, %v1783_v16  ;;  %1184 = vrot.lane.b32.xlu0 %v2175_v38, %s1847_s2  ;;  %v1289_v10 = vpop.permute.xlu2 %1288  ;;  %v1727_v38 = vpack.i.bf16 %v2124_v50, %v2117_v6  ;;  %v1470_v46 = vld [vmem:[%s2387_s6] sm:$0xff] }
 0x8e4   :  { %1309 = vmatpush.msra.mxu2 %v1289_v10 }
 0x8e5   :  { %1660 = vmatmul.msk.f32.vlgmr.msrb.gmra.mxu0 %vm91_vm1, %v897_v49  ;;  %1677 = vmatmul.msk.f32.vlgmr.msra.gmra.mxu2 %vm91_vm1, %v1286_v47 }
 0x8eb   :  { %1728 = vrot.lane.b32.xlu0 %v1727_v38, %s1850_s15  ;;  %v1315_v62 = vpop.permute.xlu2 %1314 }
 0x8f3   :  { %v1724_v9 = vpop.permute.xlu2 %1723 }
 0x8f4   :  { %v1726_v11 = vunpack.i.h.bf16 %v1724_v9  ;;  %v1725_v7 = vunpack.i.l.bf16 %v1724_v9  ;;  %v1519_v9 = vld [vmem:[%s2388_s7 + $0x68] sm:$0xff] }
 0x8f6   :  { %1407 = vmatpush.msra.mxu3 %v1725_v7  ;;  %v1517_v7 = vld [vmem:[%s2388_s7 + $0x58] sm:$0xff] }
 0x8f8   :  { %1408 = vmatpush.msra.mxu3 %v1726_v11  ;;  %v1518_v11 = vld [vmem:[%s2388_s7 + $0x60] sm:$0xff] }
 0x91e   :  { %v1023_v52 = vpop.xlane.xlu0 %1022 }
 0x91f   :  { %1798 = vrcp.f32 %v1023_v52 }
 0x925   :  { %v1799_v53 = vpop.eup %1798 }
 0x926   :  { %v1027_v54 = vmul.f32 %v1799_v53, %v1785_v25 }
 0x928   :  { %1666 = vmatmul.msk.f32.vlgmr.msra.gmra.mxu0 %vm91_vm1, %v1027_v54 }
 0x92e   :  { %v1283_v24 = vpop.xlane.xlu1 %1282 }
 0x940   :  { %v1051_v56 = vpop.f32.mrf.mxu2 }
 0x941   :  { %1342 = vrot.lane.b32.xlu2 %v1051_v56, %s1851_s16 }
 0x942   :  { %v1153_v57 = vpop.xlane.xlu0 %1152 }
 0x943   :  { %1800 = vrcp.f32 %v1153_v57 }
 0x944   :  { %1802 = vrcp.f32 %v1283_v24  ;;  %v1464_v24 = vperm.slane %v2164_v22, 3 }
 0x949   :  { %v1801_v48 = vpop.eup %1800 }
 0x94a   :  { %v1157_v60 = vmul.f32 %v1801_v48, %v1793_v19  ;;  %v1803_v6 = vpop.eup %1802 }
 0x94b   :  { %v1181_v58 = vpop.f32.mrf.mxu2  ;;  %v1287_v50 = vmul.f32 %v1803_v6, %v1787_v33 }
 0x94c   :  { %1350 = vrot.lane.b32.xlu2 %v1181_v58, %s1852_s17 }
 0x955   :  { %v1185_v61 = vpop.permute.xlu0 %1184 }
 0x956   :  { %1205 = vmatpush.msrb.mxu0 %v1185_v61  ;;  %v1467_v61 = vperm.slane %v2164_v22, 6 }
 0x957   :  { %1672 = vmatmul.msk.f32.vlgmr.msrb.gmra.mxu0 %vm91_vm1, %v1157_v60 }
 0x958   :  { %1335 = vmatpush.msra.mxu0 %v1315_v62 }
 0x95d   :  { %v1729_v15 = vpop.permute.xlu0 %1728 }
 0x95e   :  { %v1731_v1 = vunpack.i.h.bf16 %v1729_v15  ;;  %v1730_v2 = vunpack.i.l.bf16 %v1729_v15  ;;  %v1514_v15 = vld [vmem:[%s2388_s7 + $0x40] sm:$0xff] }
 0x95f   :  { %1678 = vmatmul.msk.f32.vlgmr.msra.gmra.mxu0 %vm91_vm1, %v1287_v50  ;;  %v1521_v50 = vld [vmem:[%s2388_s7 + $0x78] sm:$0xff] }
 0x960   :  { %1409 = vmatpush.msra.mxu3 %v1730_v2  ;;  %1523 = vmatpush.msrb.mxu2 %v1521_v50  ;;  %v1512_v2 = vld [vmem:[%s2388_s7 + $0x30] sm:$0xff] }
 0x962   :  { %v947_v13 = vpop.f32.mrf.mxu0  ;;  %1410 = vmatpush.msra.mxu3 %v1731_v1  ;;  %v1513_v1 = vld [vmem:[%s2388_s7 + $0x38] sm:$0xff] }
 0x968   :  { %v1311_v63 = vpop.f32.mrf.mxu2 }
 0x969   :  { %1358 = vrot.lane.b32.xlu0 %v1311_v63, %s1853_s18  ;;  %v1520_v63 = vld [vmem:[%s2388_s7 + $0x70] sm:$0xff] }
 0x96a   :  { %1524 = vmatpush.msrb.mxu2 %v1520_v63 }
 0x96c   :  { %1525 = vmatpush.msrb.mxu2 %v1519_v9  ;;  %v1592_v9 = vperm.slane %v2164_v22, 4 }
 0x96e   :  { %1526 = vmatpush.msrb.mxu2 %v1518_v11 }
 0x970   :  { %1527 = vmatpush.msrb.mxu2 %v1517_v7 }
 0x99b   :  { %v1343_v4 = vpop.permute.xlu2 %1342 }
 0x99c   :  { %v1364_v16 = vsel %vm91_vm1, %v921_v55, %v1343_v4  ;;  %v1511_v4 = vld [vmem:[%s2388_s7 + $0x28] sm:$0xff] }
 0x9a5   :  { %v1077_v14 = vpop.f32.mrf.mxu0 }
 0x9a6   :  { %1344 = vrot.lane.b32.xlu2 %v1077_v14, %s1851_s16  ;;  %v1351_v12 = vpop.permute.xlu2 %1350  ;;  %v1515_v14 = vld [vmem:[%s2388_s7 + $0x48] sm:$0xff] }
 0x9a7   :  { %v1366_v17 = vsel %vm633_vm4, %v1364_v16, %v1351_v12  ;;  %v1510_v16 = vld [vmem:[%s2388_s7 + $0x20] sm:$0xff] }
 0x9ae   :  { %1386 = vrot.lane.b32.xlu2 %v2148_v0, %s1850_s15 }
 0x9d4   :  { %v1207_v5 = vpop.f32.mrf.mxu0 }
 0x9d5   :  { %1352 = vrot.lane.b32.xlu0 %v1207_v5, %s1852_s17 }
 0x9db   :  { %v1359_v18 = vpop.permute.xlu0 %1358 }
 0x9dc   :  { %v1337_v21 = vpop.f32.mrf.mxu0  ;;  %v1368_v23 = vsel %vm636_vm5, %v1366_v17, %v1359_v18  ;;  %v1509_v18 = vld [vmem:[%s2388_s7 + $0x18] sm:$0xff] }
 0x9dd   :  { %1360 = vrot.lane.b32.xlu1 %v1337_v21, %s1853_s18  ;;  %1679 = vmatmul.msk.f32.vlgmr.msra.gmra.mxu3 %vm58_vm0, %v1368_v23  ;;  %v1508_v21 = vld [vmem:[%s2388_s7 + $0x10] sm:$0xff]  ;;  %v1507_v23 = vld [vmem:[%s2388_s7 + $0x8] sm:$0xff] }
 0xa00   :  { %v1345_v0 = vpop.permute.xlu2 %1344 }
 0xa01   :  { %v1365_v27 = vsel %vm91_vm1, %v947_v13, %v1345_v0  ;;  %v1516_v13 = vld [vmem:[%s2388_s7 + $0x50] sm:$0xff]  ;;  %v1506_v0 = vld [vmem:[%s2388_s7] sm:$0xff]  ;;  %s1855_s7 = smov [#allocation2]  }
 0xa02   :  { %1528 = vmatpush.msrb.mxu2 %v1516_v13  ;;  %v1595_v13 = vperm.slane %v2164_v22, 7  ;;  %s1604_s18 = sshll.u32 %s1855_s7, 4  ;;  %s1605_s18 = int_to_ptr.vmem [resolvable:$true] %s1604_s18 }
 0xa04   :  { %1529 = vmatpush.msrb.mxu2 %v1515_v14 }
 0xa06   :  { %1530 = vmatpush.msrb.mxu2 %v1514_v15 }
 0xa08   :  { %v1387_v31 = vpop.permute.xlu2 %1386  ;;  %1531 = vmatpush.msrb.mxu2 %v1513_v1 }
 0xa0a   :  { %1532 = vmatpush.msrb.mxu2 %v1512_v2 }
 0xa0c   :  { %1533 = vmatpush.msrb.mxu2 %v1511_v4 }
 0xa0e   :  { %1534 = vmatpush.msrb.mxu2 %v1510_v16 }
 0xa10   :  { %1535 = vmatpush.msrb.mxu2 %v1509_v18 }
 0xa12   :  { %1536 = vmatpush.msrb.mxu2 %v1508_v21 }
 0xa14   :  { %1537 = vmatpush.msrb.mxu2 %v1507_v23 }
 0xa16   :  { %1538 = vmatpush.msrb.mxu2 %v1506_v0 }
 0xa47   :  { %v1353_v25 = vpop.permute.xlu0 %1352 }
 0xa48   :  { %v1367_v28 = vsel %vm633_vm4, %v1365_v27, %v1353_v25 }
 0xa4f   :  { %v1361_v29 = vpop.permute.xlu1 %1360 }
 0xa50   :  { %v1369_v30 = vsel %vm636_vm5, %v1367_v28, %v1361_v29 }
 0xa51   :  { %1680 = vmatmul.msk.f32.gmra.mxu3 %vm58_vm0, %v1369_v30 }
 0xa60   :  { %v1412_v33 = vpop.f32.mrf.mxu3 }
 0xa61   :  { %v1413_v34 = vadd.f32 %v1412_v33, %v1387_v31 }
 0xa63   :  { %v1418_v3 = vadd.f32 %v1413_v34, %v2168_v32  ;;  %v1473_v32 = vld [vmem:[%s2387_s6 + $0x18] sm:$0xff] }
 0xa64   :  { %1493 = vmatpush.msra.mxu1 %v1473_v32 }
 0xa65   :  { %v1420_v35 = vsel %vm58_vm0, %v1418_v3, 0.0 }
 0xa66   :  { %1421 = vadd.xlane.f32.xlu0 %v1420_v35 }
 0xad4   :  { %v1415_v36 = vpop.f32.mrf.mxu3 }
 0xad5   :  { %v1416_v37 = vadd.f32 %v1415_v36, %v1387_v31  ;;  %v1474_v36 = vperm.slane %v2164_v22, 0 }
 0xad7   :  { %v1419_v8 = vadd.f32 %v1416_v37, %v2181_v45  ;;  %v1472_v45 = vld [vmem:[%s2387_s6 + $0x10] sm:$0xff] }
 0xad8   :  { %1494 = vmatpush.msra.mxu1 %v1472_v45 }
 0xad9   :  { %v1423_v39 = vsel %vm58_vm0, %v1419_v8, 0.0  ;;  %v1422_v26 = vpop.xlane.xlu0 %1421 }
 0xada   :  { %1424 = vadd.xlane.f32.xlu2 %v1423_v39  ;;  %v1426_v40 = vmul.f32 %v1422_v26, %v2136_v59  ;;  %1495 = vmatpush.msra.mxu1 %v1471_v43 }
 0xadc   :  { %v1428_v41 = vsub.f32 %v1418_v3, %v1426_v40  ;;  %1496 = vmatpush.msra.mxu1 %v1470_v46 }
 0xade   :  { %v1430_v19 = vmul.f32 %v1428_v41, %v1428_v41 }
 0xae0   :  { %v1432_v20 = vsel %vm58_vm0, %v1430_v19, 0.0  ;;  %v1522_v19 = vperm.slane %v2164_v22, 1 }
 0xae1   :  { %1433 = vadd.xlane.f32.xlu1 %v1432_v20 }
 0xb4d   :  { %v1425_v42 = vpop.xlane.xlu2 %1424 }
 0xb4e   :  { %v1427_v44 = vmul.f32 %v1425_v42, %v2136_v59 }
 0xb50   :  { %v2299_v47 = vsub.f32 %v1419_v8, %v1427_v44 }
 0xb52   :  { %v1431_v49 = vmul.f32 %v2299_v47, %v2299_v47 }
 0xb54   :  { %v1435_v10 = vsel %vm58_vm0, %v1431_v49, 0.0  ;;  %v1434_v51 = vpop.xlane.xlu1 %1433 }
 0xb55   :  { %1436 = vadd.xlane.f32.xlu0 %v1435_v10  ;;  %v1438_v52 = vmul.f32 %v1434_v51, %v2136_v59 }
 0xb57   :  { %v1440_v53 = vadd.f32 1e-05, %v1438_v52 }
 0xb59   :  { %1804 = vrsqrt.f32 %v1440_v53  ;;  %vm1448_vm1 = vweird.f32 %v1440_v53 }
 0xb5f   :  { %v1805_v54 = vpop.eup %1804 }
 0xb60   :  { %v1443_v55 = vmul.f32 %v1805_v54, %v1440_v53  ;;  %vm1449_vm15 = vweird.f32 %v1805_v54 }
 0xb61   :  { %vm1450_vm2 = vmor %vm1448_vm1, %vm1449_vm15 }
 0xb62   :  { %v1444_v38 = vmul.f32 %v1805_v54, %v1443_v55 }
 0xb64   :  { %v1445_v56 = vmul.f32 0.5, %v1444_v38 }
 0xb66   :  { %v1446_v57 = vsub.f32 1.5, %v1445_v56 }
 0xb68   :  { %v1447_v58 = vmul.f32 %v1805_v54, %v1446_v57 }
 0xb6a   :  { %v1451_v48 = vsel %vm1450_vm2, %v1805_v54, %v1447_v58 }
 0xb6b   :  { %v1462_v60 = vmul.f32 %v1451_v48, %v1428_v41 }
 0xb6d   :  { %v1465_v62 = vmul.f32 %v1464_v24, %v1462_v60 }
 0xb6f   :  { %v2307_v6 = vadd.f32 %v1467_v61, %v1465_v62 }
 0xb71   :  { %1681 = vmatmul.msk.f32.vlgmr.msra.gmra.mxu1 %vm58_vm0, %v2307_v6 }
 0xbc8   :  { %v1437_v5 = vpop.xlane.xlu0 %1436 }
 0xbc9   :  { %v1439_v12 = vmul.f32 %v1437_v5, %v2136_v59 }
 0xbcb   :  { %v1441_v17 = vadd.f32 1e-05, %v1439_v12 }
 0xbcd   :  { %1806 = vrsqrt.f32 %v1441_v17  ;;  %vm1458_vm4 = vweird.f32 %v1441_v17 }
 0xbd3   :  { %v1807_v25 = vpop.eup %1806 }
 0xbd4   :  { %v1453_v27 = vmul.f32 %v1807_v25, %v1441_v17  ;;  %vm1459_vm3 = vweird.f32 %v1807_v25 }
 0xbd5   :  { %vm1460_vm5 = vmor %vm1458_vm4, %vm1459_vm3 }
 0xbd6   :  { %v1454_v28 = vmul.f32 %v1807_v25, %v1453_v27 }
 0xbd8   :  { %v1455_v29 = vmul.f32 0.5, %v1454_v28 }
 0xbda   :  { %v1456_v30 = vsub.f32 1.5, %v1455_v29 }
 0xbdc   :  { %v1457_v31 = vmul.f32 %v1807_v25, %v1456_v30 }
 0xbde   :  { %v1461_v33 = vsel %vm1460_vm5, %v1807_v25, %v1457_v31 }
 0xbdf   :  { %v1463_v34 = vmul.f32 %v1461_v33, %v2299_v47 }
 0xbe1   :  { %v1466_v3 = vmul.f32 %v1464_v24, %v1463_v34 }
 0xbe3   :  { %v1469_v35 = vadd.f32 %v1467_v61, %v1466_v3 }
 0xbe5   :  { %1682 = vmatmul.msk.f32.gmra.mxu1 %vm58_vm0, %v1469_v35 }
 0xbee   :  { %v1498_v37 = vpop.f32.mrf.mxu1 }
 0xbef   :  { %v1499_v8 = vadd.f32 %v1498_v37, %v1474_v36 }
 0xbf1   :  { %v1504_v39 = vmax.f32 %v1499_v8, 0.0 }
 0xbf3   :  { %1539 = vmatmul.f32.vlgmr.msrb.gmra.mxu2 %v1504_v39 }
 0xc62   :  { %v1501_v26 = vpop.f32.mrf.mxu1 }
 0xc63   :  { %v1502_v40 = vadd.f32 %v1501_v26, %v1474_v36 }
 0xc65   :  { %v1505_v41 = vmax.f32 %v1502_v40, 0.0 }
 0xc67   :  { %1542 = vmatmul.f32.gmra.mxu2 %v1505_v41 }
 0xc76   :  { %v1540_v20 = vpop.f32.mrf.mxu2 }
 0xc77   :  { %v1541_v32 = vadd.f32 %v1540_v20, %v1522_v19 }
 0xc79   :  { %v1546_v42 = vadd.f32 %v1541_v32, %v2307_v6 }
 0xc7b   :  { %v1548_v45 = vsel %vm58_vm0, %v1546_v42, 0.0 }
 0xc7c   :  { %1549 = vadd.xlane.f32.xlu2 %v1548_v45 }
 0xcea   :  { %v1543_v43 = vpop.f32.mrf.mxu2 }
 0xceb   :  { %v1544_v44 = vadd.f32 %v1543_v43, %v1522_v19 }
 0xced   :  { %v1547_v46 = vadd.f32 %v1544_v44, %v1469_v35 }
 0xcef   :  { %v1550_v47 = vpop.xlane.xlu2 %1549  ;;  %v1551_v49 = vsel %vm58_vm0, %v1547_v46, 0.0 }
 0xcf0   :  { %v1554_v10 = vmul.f32 %v1550_v47, %v2136_v59  ;;  %1552 = vadd.xlane.f32.xlu0 %v1551_v49 }
 0xcf2   :  { %v1556_v51 = vsub.f32 %v1546_v42, %v1554_v10 }
 0xcf4   :  { %v1558_v52 = vmul.f32 %v1556_v51, %v1556_v51 }
 0xcf6   :  { %v1560_v53 = vsel %vm58_vm0, %v1558_v52, 0.0 }
 0xcf7   :  { %1561 = vadd.xlane.f32.xlu2 %v1560_v53 }
 0xd63   :  { %v1553_v54 = vpop.xlane.xlu0 %1552 }
 0xd64   :  { %v1555_v55 = vmul.f32 %v1553_v54, %v2136_v59 }
 0xd66   :  { %v1557_v38 = vsub.f32 %v1547_v46, %v1555_v55 }
 0xd68   :  { %v1559_v56 = vmul.f32 %v1557_v38, %v1557_v38 }
 0xd6a   :  { %v1562_v57 = vpop.xlane.xlu2 %1561  ;;  %v1563_v58 = vsel %vm58_vm0, %v1559_v56, 0.0 }
 0xd6b   :  { %v1566_v24 = vmul.f32 %v1562_v57, %v2136_v59  ;;  %1564 = vadd.xlane.f32.xlu0 %v1563_v58 }
 0xd6d   :  { %v1568_v48 = vadd.f32 1e-05, %v1566_v24 }
 0xd6f   :  { %1808 = vrsqrt.f32 %v1568_v48  ;;  %vm1576_vm7 = vweird.f32 %v1568_v48 }
 0xd75   :  { %v1809_v60 = vpop.eup %1808 }
 0xd76   :  { %v1571_v61 = vmul.f32 %v1809_v60, %v1568_v48  ;;  %vm1577_vm6 = vweird.f32 %v1809_v60 }
 0xd77   :  { %vm1578_vm8 = vmor %vm1576_vm7, %vm1577_vm6 }
 0xd78   :  { %v1572_v62 = vmul.f32 %v1809_v60, %v1571_v61 }
 0xd7a   :  { %v1573_v6 = vmul.f32 0.5, %v1572_v62 }
 0xd7c   :  { %v1574_v50 = vsub.f32 1.5, %v1573_v6 }
 0xd7e   :  { %v1575_v63 = vmul.f32 %v1809_v60, %v1574_v50 }
 0xd80   :  { %v1579_v11 = vsel %vm1578_vm8, %v1809_v60, %v1575_v63 }
 0xd81   :  { %v1590_v7 = vmul.f32 %v1579_v11, %v1556_v51 }
 0xd83   :  { %v1593_v14 = vmul.f32 %v1592_v9, %v1590_v7 }
 0xd85   :  { %v1596_v15 = vadd.f32 %v1595_v13, %v1593_v14 }
 0xd87   :  { %1598 = vst.msk [vmem:[#allocation2] sm:$0xff] %vm58_vm0, %v1596_v15 }
 0xdde   :  { %v1565_v1 = vpop.xlane.xlu0 %1564 }
 0xddf   :  { %v1567_v2 = vmul.f32 %v1565_v1, %v2136_v59 }
 0xde1   :  { %v1569_v4 = vadd.f32 1e-05, %v1567_v2 }
 0xde3   :  { %1810 = vrsqrt.f32 %v1569_v4  ;;  %vm1586_vm10 = vweird.f32 %v1569_v4 }
 0xde9   :  { %v1811_v5 = vpop.eup %1810 }
 0xdea   :  { %v1581_v12 = vmul.f32 %v1811_v5, %v1569_v4  ;;  %vm1587_vm9 = vweird.f32 %v1811_v5 }
 0xdeb   :  { %vm1588_vm11 = vmor %vm1586_vm10, %vm1587_vm9 }
 0xdec   :  { %v1582_v16 = vmul.f32 %v1811_v5, %v1581_v12 }
 0xdee   :  { %v1583_v17 = vmul.f32 0.5, %v1582_v16 }
 0xdf0   :  { %v1584_v18 = vsub.f32 1.5, %v1583_v17 }
 0xdf2   :  { %v1585_v21 = vmul.f32 %v1811_v5, %v1584_v18 }
 0xdf4   :  { %v1589_v23 = vsel %vm1588_vm11, %v1811_v5, %v1585_v21 }
 0xdf5   :  { %v1591_v22 = vmul.f32 %v1589_v23, %v1557_v38 }
 0xdf7   :  { %v1594_v59 = vmul.f32 %v1592_v9, %v1591_v22 }
 0xdf9   :  { %v1597_v0 = vadd.f32 %v1595_v13, %v1594_v59 }
 0xdfb   :  { %1599 = vst.msk [vmem:[#allocation2 + $0x8] sm:$0xff] %vm58_vm0, %v1597_v0 }
 0xdfc   :  { %1612 = dma.vmem_to_hbm [thread:$0]  %s1605_s18, 256, %s1607_s10, [#allocation3], %s1856_s19, %s1856_s19, %s1851_s16  }
 0xdfd   :  { %1836 = dma.done.wait [#allocation3], 256  }
 0xdfe   :  { %1837 = vsyncadd [#allocation3], 4294967040 }
 0xdff   :  { %1617 = vsyncpa [#allocation3], 1 }

</bundles_post_ra>
